<compile_context>
chip_gen: v7x
topology: tpu7x:2x2x1
jax: 0.10.0
libtpu: 0.0.40
codegen_flags: <defaults>
</compile_context>

<pallas_src>
import functools

import jax
import jax.numpy as jnp
from jax.experimental import pallas as pl
from jax.experimental.pallas import tpu as pltpu


LANES = 128                      # lane-dense channel padding target
VMEM_LIMIT = 32 * 1024 * 1024    # explicit scoped-VMEM budget (<= v7x 64 MiB)


def _round_up(x, m):
    return (x + m - 1) // m * m


# ---------------------------------------------------------------------------
# Kernel 1: row-tiled fused matmul + shift + ReLU for stem conv1 (im2col).
# ---------------------------------------------------------------------------
def _matmul_relu_kernel(x_ref, w_ref, s_ref, o_ref):
    y = jnp.dot(x_ref[...], w_ref[...], preferred_element_type=jnp.float32)
    y = jnp.maximum(y + s_ref[...], 0.0)          # folded conv-bias + BN, ReLU
    o_ref[...] = y.astype(o_ref.dtype)


def _tiled_matmul_relu(patches, w, shift):
    M, K = patches.shape
    cout = w.shape[1]
    TM = min(512, _round_up(M, 8))
    Mp = _round_up(M, TM)
    if Mp != M:
        patches = jnp.pad(patches, ((0, Mp - M), (0, 0)))
    y = pl.pallas_call(
        _matmul_relu_kernel,
        out_shape=jax.ShapeDtypeStruct((Mp, cout), jnp.bfloat16),
        grid=(Mp // TM,),
        in_specs=[
            pl.BlockSpec((TM, K), lambda i: (i, 0)),
            pl.BlockSpec((K, cout), lambda i: (0, 0)),
            pl.BlockSpec((1, cout), lambda i: (0, 0)),
        ],
        out_specs=pl.BlockSpec((TM, cout), lambda i: (i, 0)),
        compiler_params=pltpu.CompilerParams(
            dimension_semantics=("parallel",),
            vmem_limit_bytes=VMEM_LIMIT),
    )(patches.astype(jnp.bfloat16), w.astype(jnp.bfloat16),
      shift.reshape(1, cout).astype(jnp.float32))
    return y[:M]


def _im2col(x, k, stride, pad):
    """x:(N,H,W,C) -> patches (N*Ho*Wo, k*k*C) and (N,Ho,Wo)."""
    N, H, W, C = x.shape
    xp = jnp.pad(x, ((0, 0), (pad, pad), (pad, pad), (0, 0)))
    Ho = (H + 2 * pad - k) // stride + 1
    Wo = (W + 2 * pad - k) // stride + 1
    cols = [xp[:, i:i + Ho * stride:stride, j:j + Wo * stride:stride, :]
            for i in range(k) for j in range(k)]
    patches = jnp.stack(cols, axis=-2).reshape(N * Ho * Wo, k * k * C)
    return patches, (N, Ho, Wo)


# ---------------------------------------------------------------------------
# Kernel 2: stem conv2 (im2col matmul) that writes its result directly in the
# trunk's zero-padded (LPI, CP) layout; pad positions are zeroed with `mask`.
# ---------------------------------------------------------------------------
def _conv2_kernel(p_ref, w_ref, s_ref, m_ref, o_ref):
    y = jnp.dot(p_ref[...], w_ref[...], preferred_element_type=jnp.float32)
    y = jnp.maximum(y + s_ref[...], 0.0)          # folded BN + ReLU (f32)
    o_ref[...] = y * m_ref[...]                   # zero spatial padding rows/cols


def _conv2_to_padded(p2, mask, w2, s2, *, nb, rows):
    k2 = p2.shape[-1]
    cp = w2.shape[-1]
    return pl.pallas_call(
        _conv2_kernel,
        out_shape=jax.ShapeDtypeStruct((nb * rows, cp), jnp.float32),
        grid=(nb,),
        in_specs=[
            pl.BlockSpec((rows, k2), lambda b: (b, 0)),
            pl.BlockSpec((k2, cp), lambda b: (0, 0)),
            pl.BlockSpec((1, cp), lambda b: (0, 0)),
            pl.BlockSpec((rows, 1), lambda b: (b, 0)),
        ],
        out_specs=pl.BlockSpec((rows, cp), lambda b: (b, 0)),
        compiler_params=pltpu.CompilerParams(
            dimension_semantics=("parallel",),
            vmem_limit_bytes=VMEM_LIMIT),
    )(p2.astype(jnp.bfloat16), w2.astype(jnp.bfloat16),
      s2.reshape(1, cp).astype(jnp.float32), mask)


# ---------------------------------------------------------------------------
# Kernel 3: the fused trunk = conv3 (layer 0) + every ResBlock (layers 1..R),
# one pallas_call.  The activation lives in the revisited output VMEM block in
# the padded (rows, CP) layout across the "arbitrary" layer axis.
#
# Padded layout per image (row-major flattened): HP = H+2 rows of width
# Wp = round_up(W+2, 8); row 0 and row H+1 are zero pads, real pixel (ry,rx)
# sits at flat (1+ry)*Wp + rx, columns [W, Wp) of each row are zero pads
# (they double as the left/right conv halo of the neighbouring rows).
# ---------------------------------------------------------------------------
def _trunk_kernel(x0_ref, m_ref, w3_ref, s3_ref, w1_ref, s1_ref, o_ref, *, wp):
    l = pl.program_id(1)
    lt = o_ref.shape[0]                 # rows in this batch block
    lall = lt - 2 * wp                  # computed slab: padded rows [wp, lt-wp)

    @pl.when(l == 0)
    def _():                            # bring conv2's (padded) output on-chip
        o_ref[...] = x0_ref[...]

    x = o_ref[...]                      # resident activation, f32
    # ResBlock input ReLU; a no-op for layer 0 (conv2 output is already >= 0).
    xr32 = jnp.maximum(x, 0.0)
    xr = xr32.astype(jnp.bfloat16)
    # dx = 0 / +2 column shifts done ONCE (XLU); roll wrap-around only ever
    # reads zero pad rows.  All 9 tap windows below start 8-aligned (dy*wp).
    xr_m = pltpu.roll(xr32, 1, axis=0).astype(jnp.bfloat16)       # [i] = x[i-1]
    xr_p = pltpu.roll(xr32, lt - 1, axis=0).astype(jnp.bfloat16)  # [i] = x[i+1]

    acc = None                          # chained accumulation (MRB-friendly)
    for dy in range(3):
        base = dy * wp
        for dx, src in ((0, xr_m), (1, xr), (2, xr_p)):
            part = jnp.dot(src[base:base + lall, :], w3_ref[3 * dy + dx],
                           preferred_element_type=jnp.float32)
            acc = part if acc is None else acc + part
    y = acc + s3_ref[...]               # folded conv-bias / BN shift (f32)
    m = m_ref[wp:wp + lall, :]          # zero the pad rows / pad columns

    @pl.when(l == 0)                    # stem conv3: no ReLU / 1x1 / skip
    def _():
        o_ref[wp:wp + lall, :] = y * m

    @pl.when(l > 0)                     # ResBlock tail, never leaves VMEM
    def _():
        h = jnp.maximum(y, 0.0).astype(jnp.bfloat16)
        y2 = jnp.dot(h, w1_ref[...], preferred_element_type=jnp.float32)
        y2 = y2 + s1_ref[...] + x[wp:wp + lall, :]      # + residual (f32)
        o_ref[wp:wp + lall, :] = y2 * m


def _trunk(x0, mask, w3_s, s3_s, w1_s, s1_s, *, wp, nb, rows):
    cp = x0.shape[-1]
    nl = w3_s.shape[0]
    kernel = functools.partial(_trunk_kernel, wp=wp)
    return pl.pallas_call(
        kernel,
        out_shape=jax.ShapeDtypeStruct((nb * rows, cp), jnp.float32),
        grid=(nb, nl),                  # batch blocks parallel, layers serial
        in_specs=[
            pl.BlockSpec((rows, cp), lambda b, l: (b, 0)),
            pl.BlockSpec((rows, 1), lambda b, l: (b, 0)),
            pl.BlockSpec((None, 9, cp, cp), lambda b, l: (l, 0, 0, 0)),
            pl.BlockSpec((None, 1, cp), lambda b, l: (l, 0, 0)),
            pl.BlockSpec((None, cp, cp), lambda b, l: (l, 0, 0)),
            pl.BlockSpec((None, 1, cp), lambda b, l: (l, 0, 0)),
        ],
        out_specs=pl.BlockSpec((rows, cp), lambda b, l: (b, 0)),
        compiler_params=pltpu.CompilerParams(
            dimension_semantics=("parallel", "arbitrary"),
            vmem_limit_bytes=VMEM_LIMIT),
    )(x0, mask, w3_s, s3_s, w1_s, s1_s)


# ---------------------------------------------------------------------------
# Parameters: deterministic torch-layout weights, eval-mode BN folded into
# (weight, shift), zero-padded to 128 lanes; trunk weights stacked per layer.
# ---------------------------------------------------------------------------
def _conv_weight(key, cout, cin, k):
    kw, kb = jax.random.split(key)
    w = 0.1 * jax.random.normal(kw, (cout, cin, k, k), jnp.float32)
    b = 0.05 * jax.random.normal(kb, (cout,), jnp.float32)
    return w, b


def _bn_fold(key, c, eps=1e-5):
    k1, k2, k3, k4 = jax.random.split(key, 4)
    gamma = 1.0 + 0.1 * jax.random.normal(k1, (c,), jnp.float32)
    beta = 0.1 * jax.random.normal(k2, (c,), jnp.float32)
    mean = 0.1 * jax.random.normal(k3, (c,), jnp.float32)
    var = jax.random.uniform(k4, (c,), jnp.float32, 0.5, 1.5)
    scale = gamma / jnp.sqrt(var + eps)
    shift = beta - mean * scale
    return scale, shift


def _fold(w, b, scale, shift):
    return w * scale[:, None, None, None], b * scale + shift


def _to_khkw_cin_cout(w, cin_p, cout_p):
    """torch (cout,cin,k,k) -> (k,k,cin_p,cout_p) with zero channel padding."""
    wt = jnp.transpose(w, (2, 3, 1, 0))
    cin, cout = wt.shape[2], wt.shape[3]
    return jnp.pad(wt, ((0, 0), (0, 0), (0, cin_p - cin), (0, cout_p - cout)))


def _pad_vec(v, c):
    return jnp.pad(v, (0, c - v.shape[0]))


def init_params(key, dim_z, num_rb, cp=LANES):
    keys = jax.random.split(key, 8 + 4 * num_rb)
    ki = iter(keys)
    p = {}
    cin1_p = 8                                   # 3 real + 5 zero -> K = 128
    cin2_p = max(8, _round_up(dim_z // 2, 8))    # K = 16*cin2_p (128 @ dim_z=16)

    # conv1: 3 -> dim_z//2, 4x4/s2/p1, folded BN, ReLU in kernel.
    w, b = _conv_weight(next(ki), dim_z // 2, 3, 4)
    sc, sh = _bn_fold(next(ki), dim_z // 2)
    wf, sf = _fold(w, b, sc, sh)
    p["w1"] = _to_khkw_cin_cout(wf, cin1_p, cp).reshape(16 * cin1_p, cp)
    p["s1"] = _pad_vec(sf, cp)

    # conv2: dim_z//2 -> dim_z, 4x4/s2/p1, folded BN, ReLU in kernel.
    w, b = _conv_weight(next(ki), dim_z, dim_z // 2, 4)
    sc, sh = _bn_fold(next(ki), dim_z)
    wf, sf = _fold(w, b, sc, sh)
    p["w2"] = _to_khkw_cin_cout(wf, cin2_p, cp).reshape(16 * cin2_p, cp)
    p["s2"] = _pad_vec(sf, cp)

    # Fused trunk: layer 0 = conv3 (bias only), layers 1..num_rb = ResBlocks.
    w3s, s3s, w1s, s1s = [], [], [], []
    w, b = _conv_weight(next(ki), dim_z, dim_z, 3)
    w3s.append(_to_khkw_cin_cout(w, cp, cp).reshape(9, cp, cp))
    s3s.append(_pad_vec(b, cp))
    w1s.append(jnp.zeros((cp, cp), jnp.float32))          # unused at layer 0
    s1s.append(jnp.zeros((cp,), jnp.float32))
    for _ in range(num_rb):
        w, b = _conv_weight(next(ki), dim_z, dim_z, 3)
        sc, sh = _bn_fold(next(ki), dim_z)
        wf, sf = _fold(w, b, sc, sh)
        w3s.append(_to_khkw_cin_cout(wf, cp, cp).reshape(9, cp, cp))
        s3s.append(_pad_vec(sf, cp))
        w, b = _conv_weight(next(ki), dim_z, dim_z, 1)
        sc, sh = _bn_fold(next(ki), dim_z)
        wf, sf = _fold(w, b, sc, sh)
        w1s.append(_to_khkw_cin_cout(wf, cp, cp).reshape(cp, cp))
        s1s.append(_pad_vec(sf, cp))
    nl = 1 + num_rb
    p["w3_stack"] = jnp.stack(w3s).astype(jnp.bfloat16)
    p["s3_stack"] = jnp.stack(s3s).reshape(nl, 1, cp).astype(jnp.float32)
    p["w1_stack"] = jnp.stack(w1s).astype(jnp.bfloat16)
    p["s1_stack"] = jnp.stack(s1s).reshape(nl, 1, cp).astype(jnp.float32)
    return p


# ---------------------------------------------------------------------------
# Forward pass (EncoderVqResnet64.forward, flg_bn=True, flg_var_q=False).
# ---------------------------------------------------------------------------
@functools.partial(jax.jit, static_argnames=("dim_z",))
def encoder_forward(x_nchw, params, dim_z):
    cp = LANES
    x = jnp.transpose(x_nchw, (0, 2, 3, 1)).astype(jnp.float32)     # NHWC
    N = x.shape[0]

    # ---- conv1: im2col (cin padded 3->8 => K=128) + MXU matmul + BN + ReLU.
    cin1_p = params["w1"].shape[0] // 16
    x = jnp.pad(x, ((0, 0), (0, 0), (0, 0), (0, cin1_p - x.shape[-1])))
    patches1, (_, H1, W1) = _im2col(x, 4, 2, 1)
    y1 = _tiled_matmul_relu(patches1, params["w1"], params["s1"])
    y1 = y1.reshape(N, H1, W1, cp)

    # ---- conv2: contract only over the dim_z//2 real channels (K=128);
    #      its kernel writes directly into the trunk's padded layout.
    cin2_p = params["w2"].shape[0] // 16
    y1s = y1[..., :cin2_p]
    patches2, (_, H, W) = _im2col(y1s, 4, 2, 1)
    k2 = patches2.shape[-1]
    wp = _round_up(W + 2, 8)            # sublane-aligned padded row width
    hp = H + 2                          # 1 top pad + H real + 1 bottom pad
    lpi = hp * wp

    nb = 2 if N >= 2 else 1             # <=2 "parallel" blocks (v7x: 2 TCs)
    n_img = -(-N // nb)
    n_pad = nb * n_img
    rows = n_img * lpi

    p2 = patches2.reshape(N, H, W, k2)
    p2 = jnp.pad(p2, ((0, n_pad - N), (1, 1), (0, wp - W), (0, 0)))
    p2 = p2.reshape(n_pad * lpi, k2)

    # mask of real positions in the padded layout (shared by conv2 + trunk)
    m2 = jnp.zeros((hp, wp), jnp.float32).at[1:1 + H, :W].set(1.0)
    mask = jnp.tile(m2.reshape(1, lpi), (n_pad, 1)).reshape(n_pad * lpi, 1)

    x0 = _conv2_to_padded(p2, mask, params["w2"], params["s2"],
                          nb=nb, rows=rows)

    # ---- conv3 + all ResBlocks: one fused call, activation resident in VMEM.
    y = _trunk(x0, mask, params["w3_stack"], params["s3_stack"],
               params["w1_stack"], params["s1_stack"],
               wp=wp, nb=nb, rows=rows)

    y = y.reshape(n_pad, hp, wp, cp)[:N, 1:1 + H, :W, :dim_z]
    return jnp.transpose(y, (0, 3, 1, 2))                           # NCHW


if __name__ == "__main__":
    dim_z = 16
    num_rb = 2   # cfgs.num_rb -> (num_rb - 1) blocks in self.res + self.res_m

    key = jax.random.PRNGKey(0)
    k_x, k_p = jax.random.split(key)
    x = jax.random.normal(k_x, (2, 3, 16, 16), jnp.float32)  # NCHW input
    params = init_params(k_p, dim_z, num_rb)

    out = encoder_forward(x, params, dim_z=dim_z)
    out = jax.block_until_ready(out)

    assert out.shape == (2, dim_z, 4, 4), out.shape
    assert out.dtype == jnp.float32
    print("KERNEL_OK")
</pallas_src>

<mosaic_0001>
module attributes {stable_mosaic.version = 11 : i64} {
  func.func @_matmul_relu_kernel(%arg0: i32, %arg1: memref<128x128xbf16, #tpu.memory_space<vmem>>, %arg2: memref<128x128xbf16, #tpu.memory_space<vmem>>, %arg3: memref<1x128xf32, #tpu.memory_space<vmem>>, %arg4: memref<128x128xbf16, #tpu.memory_space<vmem>>) attributes {dimension_semantics = [#tpu.dimension_semantics<parallel>], iteration_bounds = array<i64: 1>, scalar_prefetch = 0 : i64, scratch_operands = 0 : i64, tpu.core_type = #tpu.core_type<tc>, window_params = [{transform_indices = @transform_0, window_bounds = array<i64: 128, 128>}, {pipeline_mode = #tpu.pipeline_mode<synchronous>, transform_indices = @transform_1, window_bounds = array<i64: 128, 128>}, {pipeline_mode = #tpu.pipeline_mode<synchronous>, transform_indices = @transform_2, window_bounds = array<i64: 1, 128>}, {transform_indices = @transform_3, window_bounds = array<i64: 128, 128>}]} {
    %c0 = arith.constant 0 : index
    %c0_0 = arith.constant 0 : index
    %0 = vector.load %arg1[%c0, %c0_0] : memref<128x128xbf16, #tpu.memory_space<vmem>>, vector<128x128xbf16>
    %c0_1 = arith.constant 0 : index
    %c0_2 = arith.constant 0 : index
    %1 = vector.load %arg2[%c0_1, %c0_2] : memref<128x128xbf16, #tpu.memory_space<vmem>>, vector<128x128xbf16>
    %cst = arith.constant dense<0.000000e+00> : vector<128x128xf32>
    %2 = tpu.matmul %0, %1, %cst {dimension_numbers = #tpu.dot_dimension_numbers<[1], [0], [0], [1], [0, 0, 1, 1], [], []>} : vector<128x128xbf16>, vector<128x128xbf16>, vector<128x128xf32> -> vector<128x128xf32>
    %c0_3 = arith.constant 0 : index
    %c0_4 = arith.constant 0 : index
    %3 = vector.load %arg3[%c0_3, %c0_4] : memref<1x128xf32, #tpu.memory_space<vmem>>, vector<1x128xf32>
    %4 = vector.broadcast %3 : vector<1x128xf32> to vector<128x128xf32>
    %5 = arith.addf %2, %4 : vector<128x128xf32>
    %cst_5 = arith.constant 0.000000e+00 : f32
    %6 = vector.broadcast %cst_5 : f32 to vector<128x128xf32>
    %7 = arith.maximumf %5, %6 : vector<128x128xf32>
    %8 = arith.truncf %7 : vector<128x128xf32> to vector<128x128xbf16>
    %c0_6 = arith.constant 0 : index
    %c0_7 = arith.constant 0 : index
    %9 = vector.load %arg4[%c0_6, %c0_7] : memref<128x128xbf16, #tpu.memory_space<vmem>>, vector<128x128xbf16>
    tpu.vector_store %arg4[%c0_6, %c0_7], %8 {strides = array<i32>} : memref<128x128xbf16, #tpu.memory_space<vmem>>, vector<128x128xbf16>,
    return
  }
  func.func @transform_0(%arg0: i32) -> (i32, i32) {
    %c0_i32 = arith.constant 0 : i32
    %c0_i32_0 = arith.constant 0 : i32
    return %arg0, %c0_i32 : i32, i32
  }
  func.func @transform_1(%arg0: i32) -> (i32, i32) {
    %c0_i32 = arith.constant 0 : i32
    %c0_i32_0 = arith.constant 0 : i32
    %c0_i32_1 = arith.constant 0 : i32
    return %c0_i32, %c0_i32_0 : i32, i32
  }
  func.func @transform_2(%arg0: i32) -> (i32, i32) {
    %c0_i32 = arith.constant 0 : i32
    %c0_i32_0 = arith.constant 0 : i32
    %c0_i32_1 = arith.constant 0 : i32
    return %c0_i32, %c0_i32_0 : i32, i32
  }
  func.func @transform_3(%arg0: i32) -> (i32, i32) {
    %c0_i32 = arith.constant 0 : i32
    %c0_i32_0 = arith.constant 0 : i32
    return %arg0, %c0_i32 : i32, i32
  }
}

module attributes {stable_mosaic.version = 11 : i64} {
  func.func @_conv2_kernel(%arg0: i32, %arg1: memref<48x128xbf16, #tpu.memory_space<vmem>>, %arg2: memref<128x128xbf16, #tpu.memory_space<vmem>>, %arg3: memref<1x128xf32, #tpu.memory_space<vmem>>, %arg4: memref<48x1xf32, #tpu.memory_space<vmem>>, %arg5: memref<48x128xf32, #tpu.memory_space<vmem>>) attributes {dimension_semantics = [#tpu.dimension_semantics<parallel>], iteration_bounds = array<i64: 2>, scalar_prefetch = 0 : i64, scratch_operands = 0 : i64, tpu.core_type = #tpu.core_type<tc>, window_params = [{transform_indices = @transform_0, window_bounds = array<i64: 48, 128>}, {pipeline_mode = #tpu.pipeline_mode<synchronous>, transform_indices = @transform_1, window_bounds = array<i64: 128, 128>}, {pipeline_mode = #tpu.pipeline_mode<synchronous>, transform_indices = @transform_2, window_bounds = array<i64: 1, 128>}, {transform_indices = @transform_3, window_bounds = array<i64: 48, 1>}, {transform_indices = @transform_4, window_bounds = array<i64: 48, 128>}]} {
    %c0 = arith.constant 0 : index
    %c0_0 = arith.constant 0 : index
    %0 = vector.load %arg1[%c0, %c0_0] : memref<48x128xbf16, #tpu.memory_space<vmem>>, vector<48x128xbf16>
    %c0_1 = arith.constant 0 : index
    %c0_2 = arith.constant 0 : index
    %1 = vector.load %arg2[%c0_1, %c0_2] : memref<128x128xbf16, #tpu.memory_space<vmem>>, vector<128x128xbf16>
    %cst = arith.constant dense<0.000000e+00> : vector<48x128xf32>
    %2 = tpu.matmul %0, %1, %cst {dimension_numbers = #tpu.dot_dimension_numbers<[1], [0], [0], [1], [0, 0, 1, 1], [], []>} : vector<48x128xbf16>, vector<128x128xbf16>, vector<48x128xf32> -> vector<48x128xf32>
    %c0_3 = arith.constant 0 : index
    %c0_4 = arith.constant 0 : index
    %3 = vector.load %arg3[%c0_3, %c0_4] : memref<1x128xf32, #tpu.memory_space<vmem>>, vector<1x128xf32>
    %4 = vector.broadcast %3 : vector<1x128xf32> to vector<48x128xf32>
    %5 = arith.addf %2, %4 : vector<48x128xf32>
    %cst_5 = arith.constant 0.000000e+00 : f32
    %6 = vector.broadcast %cst_5 : f32 to vector<48x128xf32>
    %7 = arith.maximumf %5, %6 : vector<48x128xf32>
    %c0_6 = arith.constant 0 : index
    %c0_7 = arith.constant 0 : index
    %8 = vector.load %arg4[%c0_6, %c0_7] : memref<48x1xf32, #tpu.memory_space<vmem>>, vector<48x1xf32>
    %9 = vector.broadcast %8 : vector<48x1xf32> to vector<48x128xf32>
    %10 = arith.mulf %7, %9 : vector<48x128xf32>
    %c0_8 = arith.constant 0 : index
    %c0_9 = arith.constant 0 : index
    %11 = vector.load %arg5[%c0_8, %c0_9] : memref<48x128xf32, #tpu.memory_space<vmem>>, vector<48x128xf32>
    tpu.vector_store %arg5[%c0_8, %c0_9], %10 {strides = array<i32>} : memref<48x128xf32, #tpu.memory_space<vmem>>, vector<48x128xf32>,
    return
  }
  func.func @transform_0(%arg0: i32) -> (i32, i32) {
    %c0_i32 = arith.constant 0 : i32
    %c0_i32_0 = arith.constant 0 : i32
    return %arg0, %c0_i32 : i32, i32
  }
  func.func @transform_1(%arg0: i32) -> (i32, i32) {
    %c0_i32 = arith.constant 0 : i32
    %c0_i32_0 = arith.constant 0 : i32
    %c0_i32_1 = arith.constant 0 : i32
    return %c0_i32, %c0_i32_0 : i32, i32
  }
  func.func @transform_2(%arg0: i32) -> (i32, i32) {
    %c0_i32 = arith.constant 0 : i32
    %c0_i32_0 = arith.constant 0 : i32
    %c0_i32_1 = arith.constant 0 : i32
    return %c0_i32, %c0_i32_0 : i32, i32
  }
  func.func @transform_3(%arg0: i32) -> (i32, i32) {
    %c0_i32 = arith.constant 0 : i32
    %c0_i32_0 = arith.constant 0 : i32
    return %arg0, %c0_i32 : i32, i32
  }
  func.func @transform_4(%arg0: i32) -> (i32, i32) {
    %c0_i32 = arith.constant 0 : i32
    %c0_i32_0 = arith.constant 0 : i32
    return %arg0, %c0_i32 : i32, i32
  }
}

module attributes {stable_mosaic.version = 11 : i64} {
  func.func @_trunk_kernel(%arg0: i32, %arg1: i32, %arg2: memref<48x128xf32, #tpu.memory_space<vmem>>, %arg3: memref<48x1xf32, #tpu.memory_space<vmem>>, %arg4: memref<1x9x128x128xbf16, #tpu.memory_space<vmem>>, %arg5: memref<1x1x128xf32, #tpu.memory_space<vmem>>, %arg6: memref<1x128x128xbf16, #tpu.memory_space<vmem>>, %arg7: memref<1x1x128xf32, #tpu.memory_space<vmem>>, %arg8: memref<48x128xf32, #tpu.memory_space<vmem>>) attributes {dimension_semantics = [#tpu.dimension_semantics<parallel>, #tpu.dimension_semantics<arbitrary>], iteration_bounds = array<i64: 2, 3>, scalar_prefetch = 0 : i64, scratch_operands = 0 : i64, tpu.core_type = #tpu.core_type<tc>, window_params = [{transform_indices = @transform_0, window_bounds = array<i64: 48, 128>}, {transform_indices = @transform_1, window_bounds = array<i64: 48, 1>}, {transform_indices = @transform_2, window_bounds = array<i64: 1, 9, 128, 128>}, {transform_indices = @transform_3, window_bounds = array<i64: 1, 1, 128>}, {transform_indices = @transform_4, window_bounds = array<i64: 1, 128, 128>}, {transform_indices = @transform_5, window_bounds = array<i64: 1, 1, 128>}, {transform_indices = @transform_6, window_bounds = array<i64: 48, 128>}]} {
    %c0_i32 = arith.constant 0 : i32
    %0 = arith.cmpi eq, %arg1, %c0_i32 : i32
    %1 = arith.extui %0 : i1 to i32
    %c0_i32_0 = arith.constant 0 : i32
    %2 = arith.cmpi ne, %1, %c0_i32_0 : i32
    scf.if %2 {
      %c0_48 = arith.constant 0 : index
      %c0_49 = arith.constant 0 : index
      %66 = vector.load %arg2[%c0_48, %c0_49] : memref<48x128xf32, #tpu.memory_space<vmem>>, vector<48x128xf32>
      %c0_50 = arith.constant 0 : index
      %c0_51 = arith.constant 0 : index
      %67 = vector.load %arg8[%c0_50, %c0_51] : memref<48x128xf32, #tpu.memory_space<vmem>>, vector<48x128xf32>
      tpu.vector_store %arg8[%c0_50, %c0_51], %66 {strides = array<i32>} : memref<48x128xf32, #tpu.memory_space<vmem>>, vector<48x128xf32>,
    } else {
    }
    %c0 = arith.constant 0 : index
    %c0_1 = arith.constant 0 : index
    %3 = vector.load %arg8[%c0, %c0_1] : memref<48x128xf32, #tpu.memory_space<vmem>>, vector<48x128xf32>
    %cst = arith.constant 0.000000e+00 : f32
    %4 = vector.broadcast %cst : f32 to vector<48x128xf32>
    %5 = arith.maximumf %3, %4 : vector<48x128xf32>
    %6 = arith.truncf %5 : vector<48x128xf32> to vector<48x128xbf16>
    %c1_i32 = arith.constant 1 : i32
    %7 = tpu.dynamic_rotate %5 by %c1_i32 dim 0 : vector<48x128xf32>, i32 -> vector<48x128xf32>
    %8 = arith.truncf %7 : vector<48x128xf32> to vector<48x128xbf16>
    %c47_i32 = arith.constant 47 : i32
    %9 = tpu.dynamic_rotate %5 by %c47_i32 dim 0 : vector<48x128xf32>, i32 -> vector<48x128xf32>
    %10 = arith.truncf %9 : vector<48x128xf32> to vector<48x128xbf16>
    %11 = vector.extract_strided_slice %8 {offsets = [0, 0], sizes = [32, 128], strides = [1, 1]} : vector<48x128xbf16> to vector<32x128xbf16>
    %c0_2 = arith.constant 0 : index
    %c0_3 = arith.constant 0 : index
    %c0_4 = arith.constant 0 : index
    %c0_5 = arith.constant 0 : index
    %12 = vector.load %arg4[%c0_2, %c0_3, %c0_4, %c0_5] : memref<1x9x128x128xbf16, #tpu.memory_space<vmem>>, vector<1x1x128x128xbf16>
    %13 = vector.shape_cast %12 : vector<1x1x128x128xbf16> to vector<128x128xbf16>
    %cst_6 = arith.constant dense<0.000000e+00> : vector<32x128xf32>
    %14 = tpu.matmul %11, %13, %cst_6 {dimension_numbers = #tpu.dot_dimension_numbers<[1], [0], [0], [1], [0, 0, 1, 1], [], []>} : vector<32x128xbf16>, vector<128x128xbf16>, vector<32x128xf32> -> vector<32x128xf32>
    %15 = vector.extract_strided_slice %6 {offsets = [0, 0], sizes = [32, 128], strides = [1, 1]} : vector<48x128xbf16> to vector<32x128xbf16>
    %c0_7 = arith.constant 0 : index
    %c1 = arith.constant 1 : index
    %c0_8 = arith.constant 0 : index
    %c0_9 = arith.constant 0 : index
    %16 = vector.load %arg4[%c0_7, %c1, %c0_8, %c0_9] : memref<1x9x128x128xbf16, #tpu.memory_space<vmem>>, vector<1x1x128x128xbf16>
    %17 = vector.shape_cast %16 : vector<1x1x128x128xbf16> to vector<128x128xbf16>
    %cst_10 = arith.constant dense<0.000000e+00> : vector<32x128xf32>
    %18 = tpu.matmul %15, %17, %cst_10 {dimension_numbers = #tpu.dot_dimension_numbers<[1], [0], [0], [1], [0, 0, 1, 1], [], []>} : vector<32x128xbf16>, vector<128x128xbf16>, vector<32x128xf32> -> vector<32x128xf32>
    %19 = arith.addf %14, %18 : vector<32x128xf32>
    %20 = vector.extract_strided_slice %10 {offsets = [0, 0], sizes = [32, 128], strides = [1, 1]} : vector<48x128xbf16> to vector<32x128xbf16>
    %c0_11 = arith.constant 0 : index
    %c2 = arith.constant 2 : index
    %c0_12 = arith.constant 0 : index
    %c0_13 = arith.constant 0 : index
    %21 = vector.load %arg4[%c0_11, %c2, %c0_12, %c0_13] : memref<1x9x128x128xbf16, #tpu.memory_space<vmem>>, vector<1x1x128x128xbf16>
    %22 = vector.shape_cast %21 : vector<1x1x128x128xbf16> to vector<128x128xbf16>
    %cst_14 = arith.constant dense<0.000000e+00> : vector<32x128xf32>
    %23 = tpu.matmul %20, %22, %cst_14 {dimension_numbers = #tpu.dot_dimension_numbers<[1], [0], [0], [1], [0, 0, 1, 1], [], []>} : vector<32x128xbf16>, vector<128x128xbf16>, vector<32x128xf32> -> vector<32x128xf32>
    %24 = arith.addf %19, %23 : vector<32x128xf32>
    %25 = vector.extract_strided_slice %8 {offsets = [8, 0], sizes = [32, 128], strides = [1, 1]} : vector<48x128xbf16> to vector<32x128xbf16>
    %c0_15 = arith.constant 0 : index
    %c3 = arith.constant 3 : index
    %c0_16 = arith.constant 0 : index
    %c0_17 = arith.constant 0 : index
    %26 = vector.load %arg4[%c0_15, %c3, %c0_16, %c0_17] : memref<1x9x128x128xbf16, #tpu.memory_space<vmem>>, vector<1x1x128x128xbf16>
    %27 = vector.shape_cast %26 : vector<1x1x128x128xbf16> to vector<128x128xbf16>
    %cst_18 = arith.constant dense<0.000000e+00> : vector<32x128xf32>
    %28 = tpu.matmul %25, %27, %cst_18 {dimension_numbers = #tpu.dot_dimension_numbers<[1], [0], [0], [1], [0, 0, 1, 1], [], []>} : vector<32x128xbf16>, vector<128x128xbf16>, vector<32x128xf32> -> vector<32x128xf32>
    %29 = arith.addf %24, %28 : vector<32x128xf32>
    %30 = vector.extract_strided_slice %6 {offsets = [8, 0], sizes = [32, 128], strides = [1, 1]} : vector<48x128xbf16> to vector<32x128xbf16>
    %c0_19 = arith.constant 0 : index
    %c4 = arith.constant 4 : index
    %c0_20 = arith.constant 0 : index
    %c0_21 = arith.constant 0 : index
    %31 = vector.load %arg4[%c0_19, %c4, %c0_20, %c0_21] : memref<1x9x128x128xbf16, #tpu.memory_space<vmem>>, vector<1x1x128x128xbf16>
    %32 = vector.shape_cast %31 : vector<1x1x128x128xbf16> to vector<128x128xbf16>
    %cst_22 = arith.constant dense<0.000000e+00> : vector<32x128xf32>
    %33 = tpu.matmul %30, %32, %cst_22 {dimension_numbers = #tpu.dot_dimension_numbers<[1], [0], [0], [1], [0, 0, 1, 1], [], []>} : vector<32x128xbf16>, vector<128x128xbf16>, vector<32x128xf32> -> vector<32x128xf32>
    %34 = arith.addf %29, %33 : vector<32x128xf32>
    %35 = vector.extract_strided_slice %10 {offsets = [8, 0], sizes = [32, 128], strides = [1, 1]} : vector<48x128xbf16> to vector<32x128xbf16>
    %c0_23 = arith.constant 0 : index
    %c5 = arith.constant 5 : index
    %c0_24 = arith.constant 0 : index
    %c0_25 = arith.constant 0 : index
    %36 = vector.load %arg4[%c0_23, %c5, %c0_24, %c0_25] : memref<1x9x128x128xbf16, #tpu.memory_space<vmem>>, vector<1x1x128x128xbf16>
    %37 = vector.shape_cast %36 : vector<1x1x128x128xbf16> to vector<128x128xbf16>
    %cst_26 = arith.constant dense<0.000000e+00> : vector<32x128xf32>
    %38 = tpu.matmul %35, %37, %cst_26 {dimension_numbers = #tpu.dot_dimension_numbers<[1], [0], [0], [1], [0, 0, 1, 1], [], []>} : vector<32x128xbf16>, vector<128x128xbf16>, vector<32x128xf32> -> vector<32x128xf32>
    %39 = arith.addf %34, %38 : vector<32x128xf32>
    %40 = vector.extract_strided_slice %8 {offsets = [16, 0], sizes = [32, 128], strides = [1, 1]} : vector<48x128xbf16> to vector<32x128xbf16>
    %c0_27 = arith.constant 0 : index
    %c6 = arith.constant 6 : index
    %c0_28 = arith.constant 0 : index
    %c0_29 = arith.constant 0 : index
    %41 = vector.load %arg4[%c0_27, %c6, %c0_28, %c0_29] : memref<1x9x128x128xbf16, #tpu.memory_space<vmem>>, vector<1x1x128x128xbf16>
    %42 = vector.shape_cast %41 : vector<1x1x128x128xbf16> to vector<128x128xbf16>
    %cst_30 = arith.constant dense<0.000000e+00> : vector<32x128xf32>
    %43 = tpu.matmul %40, %42, %cst_30 {dimension_numbers = #tpu.dot_dimension_numbers<[1], [0], [0], [1], [0, 0, 1, 1], [], []>} : vector<32x128xbf16>, vector<128x128xbf16>, vector<32x128xf32> -> vector<32x128xf32>
    %44 = arith.addf %39, %43 : vector<32x128xf32>
    %45 = vector.extract_strided_slice %6 {offsets = [16, 0], sizes = [32, 128], strides = [1, 1]} : vector<48x128xbf16> to vector<32x128xbf16>
    %c0_31 = arith.constant 0 : index
    %c7 = arith.constant 7 : index
    %c0_32 = arith.constant 0 : index
    %c0_33 = arith.constant 0 : index
    %46 = vector.load %arg4[%c0_31, %c7, %c0_32, %c0_33] : memref<1x9x128x128xbf16, #tpu.memory_space<vmem>>, vector<1x1x128x128xbf16>
    %47 = vector.shape_cast %46 : vector<1x1x128x128xbf16> to vector<128x128xbf16>
    %cst_34 = arith.constant dense<0.000000e+00> : vector<32x128xf32>
    %48 = tpu.matmul %45, %47, %cst_34 {dimension_numbers = #tpu.dot_dimension_numbers<[1], [0], [0], [1], [0, 0, 1, 1], [], []>} : vector<32x128xbf16>, vector<128x128xbf16>, vector<32x128xf32> -> vector<32x128xf32>
    %49 = arith.addf %44, %48 : vector<32x128xf32>
    %50 = vector.extract_strided_slice %10 {offsets = [16, 0], sizes = [32, 128], strides = [1, 1]} : vector<48x128xbf16> to vector<32x128xbf16>
    %c0_35 = arith.constant 0 : index
    %c8 = arith.constant 8 : index
    %c0_36 = arith.constant 0 : index
    %c0_37 = arith.constant 0 : index
    %51 = vector.load %arg4[%c0_35, %c8, %c0_36, %c0_37] : memref<1x9x128x128xbf16, #tpu.memory_space<vmem>>, vector<1x1x128x128xbf16>
    %52 = vector.shape_cast %51 : vector<1x1x128x128xbf16> to vector<128x128xbf16>
    %cst_38 = arith.constant dense<0.000000e+00> : vector<32x128xf32>
    %53 = tpu.matmul %50, %52, %cst_38 {dimension_numbers = #tpu.dot_dimension_numbers<[1], [0], [0], [1], [0, 0, 1, 1], [], []>} : vector<32x128xbf16>, vector<128x128xbf16>, vector<32x128xf32> -> vector<32x128xf32>
    %54 = arith.addf %49, %53 : vector<32x128xf32>
    %c0_39 = arith.constant 0 : index
    %c0_40 = arith.constant 0 : index
    %c0_41 = arith.constant 0 : index
    %55 = vector.load %arg5[%c0_39, %c0_40, %c0_41] : memref<1x1x128xf32, #tpu.memory_space<vmem>>, vector<1x1x128xf32>
    %56 = vector.shape_cast %55 : vector<1x1x128xf32> to vector<1x128xf32>
    %57 = vector.broadcast %56 : vector<1x128xf32> to vector<32x128xf32>
    %58 = arith.addf %54, %57 : vector<32x128xf32>
    %c8_42 = arith.constant 8 : index
    %c0_43 = arith.constant 0 : index
    %59 = vector.load %arg3[%c8_42, %c0_43] : memref<48x1xf32, #tpu.memory_space<vmem>>, vector<32x1xf32>
    %c0_i32_44 = arith.constant 0 : i32
    %60 = arith.cmpi eq, %arg1, %c0_i32_44 : i32
    %61 = arith.extui %60 : i1 to i32
    %c0_i32_45 = arith.constant 0 : i32
    %62 = arith.cmpi ne, %61, %c0_i32_45 : i32
    scf.if %62 {
      %66 = vector.broadcast %59 : vector<32x1xf32> to vector<32x128xf32>
      %67 = arith.mulf %58, %66 : vector<32x128xf32>
      %c8_48 = arith.constant 8 : index
      %c0_49 = arith.constant 0 : index
      %68 = vector.load %arg8[%c8_48, %c0_49] : memref<48x128xf32, #tpu.memory_space<vmem>>, vector<32x128xf32>
      tpu.vector_store %arg8[%c8_48, %c0_49], %67 {strides = array<i32>} : memref<48x128xf32, #tpu.memory_space<vmem>>, vector<32x128xf32>,
    } else {
    }
    %c0_i32_46 = arith.constant 0 : i32
    %63 = arith.cmpi sgt, %arg1, %c0_i32_46 : i32
    %64 = arith.extui %63 : i1 to i32
    %c0_i32_47 = arith.constant 0 : i32
    %65 = arith.cmpi ne, %64, %c0_i32_47 : i32
    scf.if %65 {
      %cst_48 = arith.constant 0.000000e+00 : f32
      %66 = vector.broadcast %cst_48 : f32 to vector<32x128xf32>
      %67 = arith.maximumf %58, %66 : vector<32x128xf32>
      %68 = arith.truncf %67 : vector<32x128xf32> to vector<32x128xbf16>
      %c0_49 = arith.constant 0 : index
      %c0_50 = arith.constant 0 : index
      %c0_51 = arith.constant 0 : index
      %69 = vector.load %arg6[%c0_49, %c0_50, %c0_51] : memref<1x128x128xbf16, #tpu.memory_space<vmem>>, vector<1x128x128xbf16>
      %70 = vector.shape_cast %69 : vector<1x128x128xbf16> to vector<128x128xbf16>
      %cst_52 = arith.constant dense<0.000000e+00> : vector<32x128xf32>
      %71 = tpu.matmul %68, %70, %cst_52 {dimension_numbers = #tpu.dot_dimension_numbers<[1], [0], [0], [1], [0, 0, 1, 1], [], []>} : vector<32x128xbf16>, vector<128x128xbf16>, vector<32x128xf32> -> vector<32x128xf32>
      %c0_53 = arith.constant 0 : index
      %c0_54 = arith.constant 0 : index
      %c0_55 = arith.constant 0 : index
      %72 = vector.load %arg7[%c0_53, %c0_54, %c0_55] : memref<1x1x128xf32, #tpu.memory_space<vmem>>, vector<1x1x128xf32>
      %73 = vector.shape_cast %72 : vector<1x1x128xf32> to vector<1x128xf32>
      %74 = vector.broadcast %73 : vector<1x128xf32> to vector<32x128xf32>
      %75 = arith.addf %71, %74 : vector<32x128xf32>
      %76 = vector.extract_strided_slice %3 {offsets = [8, 0], sizes = [32, 128], strides = [1, 1]} : vector<48x128xf32> to vector<32x128xf32>
      %77 = arith.addf %75, %76 : vector<32x128xf32>
      %78 = vector.broadcast %59 : vector<32x1xf32> to vector<32x128xf32>
      %79 = arith.mulf %77, %78 : vector<32x128xf32>
      %c8_56 = arith.constant 8 : index
      %c0_57 = arith.constant 0 : index
      %80 = vector.load %arg8[%c8_56, %c0_57] : memref<48x128xf32, #tpu.memory_space<vmem>>, vector<32x128xf32>
      tpu.vector_store %arg8[%c8_56, %c0_57], %79 {strides = array<i32>} : memref<48x128xf32, #tpu.memory_space<vmem>>, vector<32x128xf32>,
    } else {
    }
    return
  }
  func.func @transform_0(%arg0: i32, %arg1: i32) -> (i32, i32) {
    %c0_i32 = arith.constant 0 : i32
    %c0_i32_0 = arith.constant 0 : i32
    return %arg0, %c0_i32 : i32, i32
  }
  func.func @transform_1(%arg0: i32, %arg1: i32) -> (i32, i32) {
    %c0_i32 = arith.constant 0 : i32
    %c0_i32_0 = arith.constant 0 : i32
    return %arg0, %c0_i32 : i32, i32
  }
  func.func @transform_2(%arg0: i32, %arg1: i32) -> (i32, i32, i32, i32) {
    %c0_i32 = arith.constant 0 : i32
    %c0_i32_0 = arith.constant 0 : i32
    %c0_i32_1 = arith.constant 0 : i32
    %c0_i32_2 = arith.constant 0 : i32
    return %arg1, %c0_i32, %c0_i32_0, %c0_i32_1 : i32, i32, i32, i32
  }
  func.func @transform_3(%arg0: i32, %arg1: i32) -> (i32, i32, i32) {
    %c0_i32 = arith.constant 0 : i32
    %c0_i32_0 = arith.constant 0 : i32
    %c0_i32_1 = arith.constant 0 : i32
    return %arg1, %c0_i32, %c0_i32_0 : i32, i32, i32
  }
  func.func @transform_4(%arg0: i32, %arg1: i32) -> (i32, i32, i32) {
    %c0_i32 = arith.constant 0 : i32
    %c0_i32_0 = arith.constant 0 : i32
    %c0_i32_1 = arith.constant 0 : i32
    return %arg1, %c0_i32, %c0_i32_0 : i32, i32, i32
  }
  func.func @transform_5(%arg0: i32, %arg1: i32) -> (i32, i32, i32) {
    %c0_i32 = arith.constant 0 : i32
    %c0_i32_0 = arith.constant 0 : i32
    %c0_i32_1 = arith.constant 0 : i32
    return %arg1, %c0_i32, %c0_i32_0 : i32, i32, i32
  }
  func.func @transform_6(%arg0: i32, %arg1: i32) -> (i32, i32) {
    %c0_i32 = arith.constant 0 : i32
    %c0_i32_0 = arith.constant 0 : i32
    return %arg0, %c0_i32 : i32, i32
  }
}

</mosaic_0001>

<bundles_post_ra>
// kernel: encoder_forward.3
= control target key start
LH: loop header
LB: loop body
LE: loop exit
PB: predicated region body
PF: predicated region fallthrough
CT: control target
= control target key end

     0   :  { %s618_s1 = inlined_call_operand.vmem [shape: bf16[128,128], index: 1, kind: input, shape index: {}]   ;;  %s619_s0 = inlined_call_operand.vmem [shape: bf16[128,128], index: 0, kind: input, shape index: {}]   ;;  %s620_s2 = inlined_call_operand.vmem [shape: f32[1,128], index: 2, kind: input, shape index: {}]   ;;  %s621_s3 = inlined_call_operand.vmem [shape: bf16[128,128], index: 3, kind: output, shape index: {}]  }
   0x1   :  { %v507_v0 = vld [vmem:[%s618_s1] sm:$0xff]   ;;  %v508_v1 = vld [vmem:[%s618_s1 + $0x8] sm:$0xff]   ;;  %v509_v2 = vld [vmem:[%s618_s1 + $0x10] sm:$0xff]  }
   0x2   :  { %459 = vmatprep.subr.bf16.mxu0 %v507_v0  ;;  %491 = vmatprep.subr.bf16.mxu1 %v507_v0  ;;  %v510_v3 = vld [vmem:[%s618_s1 + $0x18] sm:$0xff]   ;;  %v515_v4 = vld [vmem:[%s619_s0] sm:$0xff]   ;;  %v512_v7 = vld [vmem:[%s618_s1 + $0x28] sm:$0xff]  }
   0x3   :  { %460 = vmatpush3.bf16.msra.mxu0 %v507_v0  ;;  %499 = vmatpush3.bf16.msra.mxu1 %v507_v0  ;;  %v516_v5 = vld [vmem:[%s619_s0 + $0x20] sm:$0xff]   ;;  %v513_v8 = vld [vmem:[%s618_s1 + $0x30] sm:$0xff]   ;;  %v514_v9 = vld [vmem:[%s618_s1 + $0x38] sm:$0xff]  }
   0x4   :  { %461 = vmatprep.subr.bf16.mxu0 %v508_v1  ;;  %492 = vmatprep.subr.bf16.mxu1 %v508_v1  ;;  %v511_v6 = vld [vmem:[%s618_s1 + $0x20] sm:$0xff]   ;;  %v517_v10 = vld [vmem:[%s619_s0 + $0x8] sm:$0xff]   ;;  %v519_v12 = vld [vmem:[%s619_s0 + $0x10] sm:$0xff]  }
   0x5   :  { %475 = vmatprep.mubr.bf16.mxu0 %v515_v4  ;;  %483 = vmatprep.mubr.bf16.mxu1 %v516_v5  ;;  %v518_v11 = vld [vmem:[%s619_s0 + $0x28] sm:$0xff]   ;;  %v520_v13 = vld [vmem:[%s619_s0 + $0x30] sm:$0xff]   ;;  %v521_v14 = vld [vmem:[%s619_s0 + $0x18] sm:$0xff]  }
   0x6   :  { %v522_v15 = vld [vmem:[%s619_s0 + $0x38] sm:$0xff]   ;;  %v347_v16 = vld [vmem:[%s620_s2] ss:$0 sm:$0xff] }
   0x7   :  { %462 = vmatpush3.bf16.msra.mxu0 %v508_v1  ;;  %500 = vmatpush3.bf16.msra.mxu1 %v508_v1 }
   0x8   :  { %463 = vmatprep.subr.bf16.mxu0 %v509_v2  ;;  %493 = vmatprep.subr.bf16.mxu1 %v509_v2 }
   0xb   :  { %464 = vmatpush3.bf16.msra.mxu0 %v509_v2  ;;  %501 = vmatpush3.bf16.msra.mxu1 %v509_v2 }
   0xc   :  { %465 = vmatprep.subr.bf16.mxu0 %v510_v3  ;;  %494 = vmatprep.subr.bf16.mxu1 %v510_v3 }
   0xf   :  { %466 = vmatpush3.bf16.msra.mxu0 %v510_v3  ;;  %502 = vmatpush3.bf16.msra.mxu1 %v510_v3 }
  0x10   :  { %467 = vmatprep.subr.bf16.mxu0 %v511_v6  ;;  %495 = vmatprep.subr.bf16.mxu1 %v511_v6 }
  0x13   :  { %468 = vmatpush3.bf16.msra.mxu0 %v511_v6  ;;  %503 = vmatpush3.bf16.msra.mxu1 %v511_v6 }
  0x14   :  { %469 = vmatprep.subr.bf16.mxu0 %v512_v7  ;;  %496 = vmatprep.subr.bf16.mxu1 %v512_v7 }
  0x17   :  { %470 = vmatpush3.bf16.msra.mxu0 %v512_v7  ;;  %504 = vmatpush3.bf16.msra.mxu1 %v512_v7 }
  0x18   :  { %471 = vmatprep.subr.bf16.mxu0 %v513_v8  ;;  %497 = vmatprep.subr.bf16.mxu1 %v513_v8 }
  0x1b   :  { %472 = vmatpush3.bf16.msra.mxu0 %v513_v8  ;;  %505 = vmatpush3.bf16.msra.mxu1 %v513_v8 }
  0x1c   :  { %473 = vmatprep.subr.bf16.mxu0 %v514_v9  ;;  %498 = vmatprep.subr.bf16.mxu1 %v514_v9 }
  0x1f   :  { %474 = vmatpush3.bf16.msra.mxu0 %v514_v9  ;;  %506 = vmatpush3.bf16.msra.mxu1 %v514_v9 }
  0x22   :  { %476 = vmatmul.mubr.bf16.vlgmr.msra.gmra.mrb[0].mxu0 %v517_v10  ;;  %484 = vmatmul.mubr.bf16.vlgmr.msra.gmra.mrb[0].mxu1 %v518_v11 }
  0x23   :  { %479 = vmatprep.mubr.bf16.mxu0 %v519_v12  ;;  %487 = vmatprep.mubr.bf16.mxu1 %v520_v13 }
  0x2a   :  { %480 = vmatmul.mubr.bf16.gmra.mrb[4].mxu0 %v521_v14  ;;  %488 = vmatmul.mubr.bf16.gmra.mrb[4].mxu1 %v522_v15 }
  0xf5   :  { %v477_v17 = vpop.f32.mrb[0].mxu0  ;;  %v485_v18 = vpop.f32.mrb[0].mxu1 }
  0xf6   :  { %v193_v19 = vadd.f32 %v477_v17, %v347_v16  ;;  %v225_v20 = vadd.f32 %v485_v18, %v347_v16  ;;  %v184_v21 = vpop.f32.mrb[1].mxu0  ;;  %v216_v22 = vpop.f32.mrb[1].mxu1 }
  0xf7   :  { %v185_v23 = vadd.f32 %v347_v16, %v184_v21  ;;  %v217_v24 = vadd.f32 %v347_v16, %v216_v22  ;;  %v478_v25 = vpop.f32.mrb[2].mxu0  ;;  %v486_v26 = vpop.f32.mrb[2].mxu1 }
  0xf8   :  { %v196_v27 = vadd.f32 %v478_v25, %v347_v16  ;;  %v228_v28 = vadd.f32 %v486_v26, %v347_v16  ;;  %v187_v29 = vpop.f32.mrb[3].mxu0  ;;  %v219_v30 = vpop.f32.mrb[3].mxu1  ;;  %v249_v33 = vmax.f32 %v193_v19, 0.0  ;;  %v257_v34 = vmax.f32 %v225_v20, 0.0 }
  0xf9   :  { %v188_v31 = vadd.f32 %v347_v16, %v187_v29  ;;  %v220_v32 = vadd.f32 %v347_v16, %v219_v30  ;;  %v247_v37 = vmax.f32 %v185_v23, 0.0  ;;  %v255_v38 = vmax.f32 %v217_v24, 0.0 }
  0xfa   :  { %v250_v35 = vmax.f32 %v196_v27, 0.0  ;;  %v258_v36 = vmax.f32 %v228_v28, 0.0 }
  0xfb   :  { %v248_v39 = vmax.f32 %v188_v31, 0.0  ;;  %v256_v40 = vmax.f32 %v220_v32, 0.0 }
  0xfc   :  { %v404_v41 = vpack.c.bf16 %v250_v35, %v249_v33  ;;  %v424_v42 = vpack.c.bf16 %v258_v36, %v257_v34 }
  0xfd   :  { %v399_v43 = vpack.c.bf16 %v248_v39, %v247_v37  ;;  %v419_v44 = vpack.c.bf16 %v256_v40, %v255_v38  ;;  %v481_v45 = vpop.f32.mrb[4].mxu0  ;;  %v489_v46 = vpop.f32.mrb[4].mxu1 }
  0xfe   :  { %436 = vst [vmem:[%s621_s3 + $0x8] sm:$0xff] %v404_v41   ;;  %440 = vst [vmem:[%s621_s3 + $0x28] sm:$0xff] %v424_v42   ;;  %v209_v47 = vadd.f32 %v481_v45, %v347_v16  ;;  %v241_v48 = vadd.f32 %v489_v46, %v347_v16  ;;  %v200_v49 = vpop.f32.mrb[5].mxu0  ;;  %v232_v50 = vpop.f32.mrb[5].mxu1 }
  0xff   :  { %400 = vst [vmem:[%s621_s3] sm:$0xff] %v399_v43   ;;  %439 = vst [vmem:[%s621_s3 + $0x20] sm:$0xff] %v419_v44   ;;  %v201_v51 = vadd.f32 %v347_v16, %v200_v49  ;;  %v233_v52 = vadd.f32 %v347_v16, %v232_v50  ;;  %v482_v53 = vpop.f32.mrb[6].mxu0  ;;  %v490_v54 = vpop.f32.mrb[6].mxu1 }
 0x100   :  { %v212_v55 = vadd.f32 %v482_v53, %v347_v16  ;;  %v244_v56 = vadd.f32 %v490_v54, %v347_v16  ;;  %v203_v57 = vpop.f32.mrb[7].mxu0  ;;  %v235_v58 = vpop.f32.mrb[7].mxu1  ;;  %v253_v61 = vmax.f32 %v209_v47, 0.0  ;;  %v261_v62 = vmax.f32 %v241_v48, 0.0 }
 0x101   :  { %v204_v59 = vadd.f32 %v347_v16, %v203_v57  ;;  %v236_v60 = vadd.f32 %v347_v16, %v235_v58  ;;  %v251_v1 = vmax.f32 %v201_v51, 0.0  ;;  %v259_v2 = vmax.f32 %v233_v52, 0.0 }
 0x102   :  { %v254_v63 = vmax.f32 %v212_v55, 0.0  ;;  %v262_v0 = vmax.f32 %v244_v56, 0.0 }
 0x103   :  { %v252_v3 = vmax.f32 %v204_v59, 0.0  ;;  %v260_v4 = vmax.f32 %v236_v60, 0.0 }
 0x104   :  { %v414_v5 = vpack.c.bf16 %v254_v63, %v253_v61  ;;  %v434_v6 = vpack.c.bf16 %v262_v0, %v261_v62 }
 0x105   :  { %v409_v7 = vpack.c.bf16 %v252_v3, %v251_v1  ;;  %v429_v8 = vpack.c.bf16 %v260_v4, %v259_v2 }
 0x106   :  { %438 = vst [vmem:[%s621_s3 + $0x18] sm:$0xff] %v414_v5   ;;  %442 = vst [vmem:[%s621_s3 + $0x38] sm:$0xff] %v434_v6  }
 0x107   :  { %437 = vst [vmem:[%s621_s3 + $0x10] sm:$0xff] %v409_v7   ;;  %441 = vst [vmem:[%s621_s3 + $0x30] sm:$0xff] %v429_v8  }

// kernel: tile.6
= control target key start
LH: loop header
LB: loop body
LE: loop exit
PB: predicated region body
PF: predicated region fallthrough
CT: control target
= control target key end

     0   :  { %s22_s0 = inlined_call_operand.vmem [shape: f32[48], index: 0, kind: input, shape index: {}]   ;;  %s23_s1 = inlined_call_operand.vmem [shape: f32[2,1,1,48], index: 1, kind: output, shape index: {}]  }
   0x1   :  { %v4_v0 = vld [vmem:[%s22_s0] ss:$0 sm:$0xff] }
   0x2   :  { %5 = vst [vmem:[%s23_s1] sm:$0x3] %v4_v0 }

// kernel: tile.0
= control target key start
LH: loop header
LB: loop body
LE: loop exit
PB: predicated region body
PF: predicated region fallthrough
CT: control target
= control target key end

     0   :  { %s418_s8 = smov 125   ;;  %s419_s9 = smov 126   ;;  %vm7_vm0 = vcmask 7168   ;;  %s669_s0 = inlined_call_operand.vmem [shape: f32[2,1,1,48], index: 0, kind: input, shape index: {}]   ;;  %s670_s1 = inlined_call_operand.vmem [shape: f32[96,1], index: 1, kind: output, shape index: {}]  }
   0x1   :  { %v4_v0 = vld [vmem:[%s669_s0] sm:$0x3]  ;;  %s417_s0 = smov 127   ;;  %s420_s10 = smov 124  }
   0x2   :  { %5 = vst [vmem:[#allocation0] sm:$0x3] %v4_v0  ;;  %s421_s11 = smov 123   ;;  %s422_s12 = smov 122  }
   0x3   :  { %s423_s13 = smov 121   ;;  %s424_s14 = smov 120  }
   0x4   :  { %s425_s15 = smov 119   ;;  %s426_s16 = smov 118  }
   0x5   :  { %s427_s17 = smov 117   ;;  %s428_s18 = smov 116  }
   0x6   :  { %s100_s19 = smov 3  ;;  %s429_s20 = smov 115  }
   0x7   :  { %s430_s21 = smov 114   ;;  %s108_s22 = smov 3 }
   0x8   :  { %s116_s23 = smov 3  ;;  %s431_s24 = smov 113  }
   0x9   :  { %v9_v1 = vld [vmem:[#allocation0] sm:$0x3]   ;;  %s432_s25 = smov 112   ;;  %s124_s26 = smov 3 }
   0xa   :  { %v21_v2 = vld [vmem:[#allocation0] sm:$0x3]   ;;  %10 = vrot.lane.b32.xlu0 %v9_v1, %s417_s0  ;;  %s132_s27 = smov 3  ;;  %s433_s28 = smov 111  }
   0xb   :  { %22 = vrot.lane.b32.xlu1 %v21_v2, %s418_s8  ;;  %v15_v3 = vld [vmem:[#allocation0] sm:$0x3]   ;;  %s434_s29 = smov 110   ;;  %s140_s30 = smov 3 }
   0xc   :  { %v27_v4 = vld [vmem:[#allocation0] sm:$0x3]   ;;  %s148_s2 = smov 3  ;;  %s435_s3 = smov 109  }
   0xd   :  { %v33_v5 = vld [vmem:[#allocation0] sm:$0x3]   ;;  %s436_s4 = smov 108   ;;  %s156_s5 = smov 3 }
   0xe   :  { %16 = vrot.lane.b32.xlu0 %v15_v3, %s419_s9  ;;  %v39_v6 = vld [vmem:[#allocation0] sm:$0x3]   ;;  %s164_s6 = smov 3  ;;  %s437_s7 = smov 107  }
   0xf   :  { %28 = vrot.lane.b32.xlu1 %v27_v4, %s420_s10  ;;  %v45_v7 = vld [vmem:[#allocation0] sm:$0x3]   ;;  %s438_s0 = smov 106   ;;  %s172_s8 = smov 3 }
  0x10   :  { %v51_v8 = vld [vmem:[#allocation0] sm:$0x3]   ;;  %s180_s9 = smov 3  ;;  %s439_s10 = smov 105  }
  0x11   :  { %v57_v9 = vld [vmem:[#allocation0] sm:$0x3]  }
  0x12   :  { %34 = vrot.lane.b32.xlu0 %v33_v5, %s421_s11  ;;  %v63_v10 = vld [vmem:[#allocation0] sm:$0x3]   ;;  %s440_s11 = smov 104  }
  0x13   :  { %40 = vrot.lane.b32.xlu1 %v39_v6, %s422_s12  ;;  %v69_v11 = vld [vmem:[#allocation0] sm:$0x3]   ;;  %s188_s12 = smov 3 }
  0x14   :  { %v75_v12 = vld [vmem:[#allocation0] sm:$0x3]  }
  0x15   :  { %v81_v13 = vld [vmem:[#allocation0] sm:$0x3]  }
  0x16   :  { %46 = vrot.lane.b32.xlu0 %v45_v7, %s423_s13  ;;  %v87_v14 = vld [vmem:[#allocation0] sm:$0x3]   ;;  %s196_s13 = smov 3 }
  0x17   :  { %52 = vrot.lane.b32.xlu1 %v51_v8, %s424_s14  ;;  %v93_v15 = vld [vmem:[#allocation0] sm:$0x3]   ;;  %s441_s14 = smov 103  }
  0x18   :  { %v101_v16 = vld [vmem:[#allocation0 + $0x1] ss:$-1 sm:%s100_s19]   ;;  %s444_s19 = smov 100  }
  0x19   :  { %v109_v17 = vld [vmem:[#allocation0 + $0x1] ss:$-1 sm:%s108_s22]   ;;  %s446_s22 = smov 98  }
  0x1a   :  { %58 = vrot.lane.b32.xlu0 %v57_v9, %s425_s15  ;;  %v117_v18 = vld [vmem:[#allocation0 + $0x1] ss:$-1 sm:%s116_s23]   ;;  %s442_s15 = smov 102   ;;  %s447_s23 = smov 97  }
  0x1b   :  { %64 = vrot.lane.b32.xlu1 %v63_v10, %s426_s16  ;;  %v125_v19 = vld [vmem:[#allocation0 + $0x1] ss:$-1 sm:%s124_s26]   ;;  %s204_s16 = smov 3  ;;  %s450_s26 = smov 94  }
  0x1c   :  { %v133_v20 = vld [vmem:[#allocation0 + $0x1] ss:$-1 sm:%s132_s27]   ;;  %s451_s27 = smov 93  }
  0x1d   :  { %v141_v21 = vld [vmem:[#allocation0 + $0x1] ss:$-1 sm:%s140_s30]   ;;  %s454_s30 = smov 90  }
  0x1e   :  { %70 = vrot.lane.b32.xlu0 %v69_v11, %s427_s17  ;;  %v149_v22 = vld [vmem:[#allocation0 + $0x1] ss:$-1 sm:%s148_s2]   ;;  %s212_s17 = smov 3  ;;  %s455_s2 = smov 89  }
  0x1f   :  { %76 = vrot.lane.b32.xlu1 %v75_v12, %s428_s18  ;;  %v157_v23 = vld [vmem:[#allocation0 + $0x1] ss:$-1 sm:%s156_s5]   ;;  %s443_s18 = smov 101  }
  0x20   :  { %v165_v24 = vld [vmem:[#allocation0 + $0x1] ss:$-1 sm:%s164_s6]   ;;  %s457_s6 = smov 87  }
  0x21   :  { %v173_v25 = vld [vmem:[#allocation0 + $0x1] ss:$-1 sm:%s172_s8]   ;;  %s460_s8 = smov 84  }
  0x22   :  { %82 = vrot.lane.b32.xlu0 %v81_v13, %s429_s20  ;;  %v181_v26 = vld [vmem:[#allocation0 + $0x1] ss:$-1 sm:%s180_s9]   ;;  %s220_s20 = smov 3  ;;  %s461_s9 = smov 83  }
  0x23   :  { %88 = vrot.lane.b32.xlu1 %v87_v14, %s430_s21  ;;  %v189_v27 = vld [vmem:[#allocation0 + $0x1] ss:$-1 sm:%s188_s12]   ;;  %s445_s21 = smov 99  }
  0x24   :  { %v197_v28 = vld [vmem:[#allocation0 + $0x1] ss:$-1 sm:%s196_s13]  }
  0x25   :  { %v205_v29 = vld [vmem:[#allocation0 + $0x1] ss:$-1 sm:%s204_s16]  }
  0x26   :  { %94 = vrot.lane.b32.xlu0 %v93_v15, %s431_s24  ;;  %v213_v30 = vld [vmem:[#allocation0 + $0x1] ss:$-1 sm:%s212_s17]   ;;  %s448_s24 = smov 96  }
  0x27   :  { %102 = vrot.lane.b32.xlu1 %v101_v16, %s432_s25  ;;  %v221_v31 = vld [vmem:[#allocation0 + $0x1] ss:$-1 sm:%s220_s20]   ;;  %s449_s25 = smov 95  }
  0x28   :  { %v227_v32 = vld [vmem:[#allocation0] sm:$0x3]  }
  0x29   :  { %v233_v33 = vld [vmem:[#allocation0] sm:$0x3]  }
  0x2a   :  { %110 = vrot.lane.b32.xlu0 %v109_v17, %s433_s28  ;;  %v239_v34 = vld [vmem:[#allocation0] sm:$0x3]   ;;  %s452_s28 = smov 92  }
  0x2b   :  { %118 = vrot.lane.b32.xlu1 %v117_v18, %s434_s29  ;;  %v245_v35 = vld [vmem:[#allocation0] sm:$0x3]   ;;  %s453_s29 = smov 91  }
  0x2c   :  { %v251_v36 = vld [vmem:[#allocation0] sm:$0x3]  }
  0x2d   :  { %v257_v37 = vld [vmem:[#allocation0] sm:$0x3]  }
  0x2e   :  { %126 = vrot.lane.b32.xlu0 %v125_v19, %s435_s3  ;;  %v263_v38 = vld [vmem:[#allocation0] sm:$0x3]   ;;  %s456_s3 = smov 88  }
  0x2f   :  { %134 = vrot.lane.b32.xlu1 %v133_v20, %s436_s4  ;;  %v269_v39 = vld [vmem:[#allocation0] sm:$0x3]  }
  0x30   :  { %v275_v40 = vld [vmem:[#allocation0] sm:$0x3]  }
  0x31   :  { %v281_v41 = vld [vmem:[#allocation0] sm:$0x3]  }
  0x32   :  { %142 = vrot.lane.b32.xlu0 %v141_v21, %s437_s7  ;;  %v287_v42 = vld [vmem:[#allocation0] sm:$0x3]   ;;  %s458_s7 = smov 86  }
  0x33   :  { %150 = vrot.lane.b32.xlu1 %v149_v22, %s438_s0  ;;  %v6_v43 = vld [vmem:[#allocation0] sm:$0x3]   ;;  %s459_s0 = smov 85  }
  0x34   :  { %8 = vst.msk [vmem:[%s670_s1] ss:$48 sm:$0x3] %vm7_vm0, %v6_v43   ;;  %v293_v44 = vld [vmem:[#allocation0] sm:$0x3]  }
  0x35   :  { %v299_v45 = vld [vmem:[#allocation0] sm:$0x3]  }
  0x36   :  { %158 = vrot.lane.b32.xlu0 %v157_v23, %s439_s10  ;;  %v305_v46 = vld [vmem:[#allocation0] sm:$0x3]   ;;  %s462_s10 = smov 82  }
  0x37   :  { %166 = vrot.lane.b32.xlu1 %v165_v24, %s440_s11  ;;  %v311_v47 = vld [vmem:[#allocation0] sm:$0x3]   ;;  %s463_s11 = smov 81  }
  0x38   :  { %v317_v48 = vld [vmem:[#allocation0] sm:$0x3]  }
  0x3a   :  { %174 = vrot.lane.b32.xlu0 %v173_v25, %s441_s14 }
  0x3b   :  { %182 = vrot.lane.b32.xlu1 %v181_v26, %s442_s15 }
  0x3e   :  { %190 = vrot.lane.b32.xlu0 %v189_v27, %s443_s18 }
  0x3f   :  { %198 = vrot.lane.b32.xlu1 %v197_v28, %s444_s19 }
  0x42   :  { %206 = vrot.lane.b32.xlu0 %v205_v29, %s445_s21 }
  0x43   :  { %214 = vrot.lane.b32.xlu1 %v213_v30, %s446_s22 }
  0x46   :  { %222 = vrot.lane.b32.xlu0 %v221_v31, %s447_s23 }
  0x47   :  { %228 = vrot.lane.b32.xlu1 %v227_v32, %s448_s24 }
  0x4a   :  { %234 = vrot.lane.b32.xlu0 %v233_v33, %s449_s25 }
  0x4b   :  { %240 = vrot.lane.b32.xlu1 %v239_v34, %s450_s26 }
  0x4e   :  { %246 = vrot.lane.b32.xlu0 %v245_v35, %s451_s27 }
  0x4f   :  { %252 = vrot.lane.b32.xlu1 %v251_v36, %s452_s28 }
  0x52   :  { %258 = vrot.lane.b32.xlu0 %v257_v37, %s453_s29 }
  0x53   :  { %264 = vrot.lane.b32.xlu1 %v263_v38, %s454_s30 }
  0x56   :  { %270 = vrot.lane.b32.xlu0 %v269_v39, %s455_s2 }
  0x57   :  { %276 = vrot.lane.b32.xlu1 %v275_v40, %s456_s3 }
  0x5a   :  { %282 = vrot.lane.b32.xlu0 %v281_v41, %s457_s6 }
  0x5b   :  { %288 = vrot.lane.b32.xlu1 %v287_v42, %s458_s7 }
  0x5e   :  { %294 = vrot.lane.b32.xlu0 %v293_v44, %s459_s0 }
  0x5f   :  { %300 = vrot.lane.b32.xlu1 %v299_v45, %s460_s8 }
  0x62   :  { %306 = vrot.lane.b32.xlu0 %v305_v46, %s461_s9 }
  0x63   :  { %312 = vrot.lane.b32.xlu1 %v311_v47, %s462_s10 }
  0x66   :  { %318 = vrot.lane.b32.xlu0 %v317_v48, %s463_s11 }
  0x7c   :  { %v11_v49 = vpop.permute.xlu0 %10  }
  0x7d   :  { %v23_v50 = vpop.permute.xlu1 %22   ;;  %323 = vst.msk [vmem:[%s670_s1 + $0x1] ss:$48 sm:$0x3] %vm7_vm0, %v11_v49  }
  0x7e   :  { %325 = vst.msk [vmem:[%s670_s1 + $0x3] ss:$48 sm:$0x3] %vm7_vm0, %v23_v50  }
  0x80   :  { %v17_v51 = vpop.permute.xlu0 %16  }
  0x81   :  { %v29_v52 = vpop.permute.xlu1 %28   ;;  %324 = vst.msk [vmem:[%s670_s1 + $0x2] ss:$48 sm:$0x3] %vm7_vm0, %v17_v51  }
  0x82   :  { %326 = vst.msk [vmem:[%s670_s1 + $0x4] ss:$48 sm:$0x3] %vm7_vm0, %v29_v52  }
  0x84   :  { %v35_v53 = vpop.permute.xlu0 %34  }
  0x85   :  { %v41_v54 = vpop.permute.xlu1 %40   ;;  %327 = vst.msk [vmem:[%s670_s1 + $0x5] ss:$48 sm:$0x3] %vm7_vm0, %v35_v53  }
  0x86   :  { %328 = vst.msk [vmem:[%s670_s1 + $0x6] ss:$48 sm:$0x3] %vm7_vm0, %v41_v54  }
  0x88   :  { %v47_v55 = vpop.permute.xlu0 %46  }
  0x89   :  { %v53_v56 = vpop.permute.xlu1 %52   ;;  %329 = vst.msk [vmem:[%s670_s1 + $0x7] ss:$48 sm:$0x3] %vm7_vm0, %v47_v55  }
  0x8a   :  { %330 = vst.msk [vmem:[%s670_s1 + $0x8] ss:$48 sm:$0x3] %vm7_vm0, %v53_v56  }
  0x8c   :  { %v59_v57 = vpop.permute.xlu0 %58  }
  0x8d   :  { %v65_v58 = vpop.permute.xlu1 %64   ;;  %331 = vst.msk [vmem:[%s670_s1 + $0x9] ss:$48 sm:$0x3] %vm7_vm0, %v59_v57  }
  0x8e   :  { %332 = vst.msk [vmem:[%s670_s1 + $0xa] ss:$48 sm:$0x3] %vm7_vm0, %v65_v58  }
  0x90   :  { %v71_v59 = vpop.permute.xlu0 %70  }
  0x91   :  { %v77_v60 = vpop.permute.xlu1 %76   ;;  %333 = vst.msk [vmem:[%s670_s1 + $0xb] ss:$48 sm:$0x3] %vm7_vm0, %v71_v59  }
  0x92   :  { %334 = vst.msk [vmem:[%s670_s1 + $0xc] ss:$48 sm:$0x3] %vm7_vm0, %v77_v60  }
  0x94   :  { %v83_v61 = vpop.permute.xlu0 %82  }
  0x95   :  { %v89_v62 = vpop.permute.xlu1 %88   ;;  %335 = vst.msk [vmem:[%s670_s1 + $0xd] ss:$48 sm:$0x3] %vm7_vm0, %v83_v61  }
  0x96   :  { %336 = vst.msk [vmem:[%s670_s1 + $0xe] ss:$48 sm:$0x3] %vm7_vm0, %v89_v62  }
  0x98   :  { %v95_v63 = vpop.permute.xlu0 %94  }
  0x99   :  { %v103_v0 = vpop.permute.xlu1 %102   ;;  %337 = vst.msk [vmem:[%s670_s1 + $0xf] ss:$48 sm:$0x3] %vm7_vm0, %v95_v63  }
  0x9a   :  { %338 = vst.msk [vmem:[%s670_s1 + $0x40] ss:$-48 sm:$0x3] %vm7_vm0, %v103_v0  }
  0x9c   :  { %v111_v1 = vpop.permute.xlu0 %110  }
  0x9d   :  { %v119_v2 = vpop.permute.xlu1 %118   ;;  %339 = vst.msk [vmem:[%s670_s1 + $0x41] ss:$-48 sm:$0x3] %vm7_vm0, %v111_v1  }
  0x9e   :  { %340 = vst.msk [vmem:[%s670_s1 + $0x42] ss:$-48 sm:$0x3] %vm7_vm0, %v119_v2  }
  0xa0   :  { %v127_v3 = vpop.permute.xlu0 %126  }
  0xa1   :  { %v135_v4 = vpop.permute.xlu1 %134   ;;  %341 = vst.msk [vmem:[%s670_s1 + $0x43] ss:$-48 sm:$0x3] %vm7_vm0, %v127_v3  }
  0xa2   :  { %342 = vst.msk [vmem:[%s670_s1 + $0x44] ss:$-48 sm:$0x3] %vm7_vm0, %v135_v4  }
  0xa4   :  { %v143_v5 = vpop.permute.xlu0 %142  }
  0xa5   :  { %v151_v6 = vpop.permute.xlu1 %150   ;;  %343 = vst.msk [vmem:[%s670_s1 + $0x45] ss:$-48 sm:$0x3] %vm7_vm0, %v143_v5  }
  0xa6   :  { %344 = vst.msk [vmem:[%s670_s1 + $0x46] ss:$-48 sm:$0x3] %vm7_vm0, %v151_v6  }
  0xa8   :  { %v159_v7 = vpop.permute.xlu0 %158  }
  0xa9   :  { %v167_v8 = vpop.permute.xlu1 %166   ;;  %345 = vst.msk [vmem:[%s670_s1 + $0x47] ss:$-48 sm:$0x3] %vm7_vm0, %v159_v7  }
  0xaa   :  { %346 = vst.msk [vmem:[%s670_s1 + $0x48] ss:$-48 sm:$0x3] %vm7_vm0, %v167_v8  }
  0xac   :  { %v175_v9 = vpop.permute.xlu0 %174  }
  0xad   :  { %v183_v10 = vpop.permute.xlu1 %182   ;;  %347 = vst.msk [vmem:[%s670_s1 + $0x49] ss:$-48 sm:$0x3] %vm7_vm0, %v175_v9  }
  0xae   :  { %348 = vst.msk [vmem:[%s670_s1 + $0x4a] ss:$-48 sm:$0x3] %vm7_vm0, %v183_v10  }
  0xb0   :  { %v191_v11 = vpop.permute.xlu0 %190  }
  0xb1   :  { %v199_v12 = vpop.permute.xlu1 %198   ;;  %349 = vst.msk [vmem:[%s670_s1 + $0x4b] ss:$-48 sm:$0x3] %vm7_vm0, %v191_v11  }
  0xb2   :  { %350 = vst.msk [vmem:[%s670_s1 + $0x4c] ss:$-48 sm:$0x3] %vm7_vm0, %v199_v12  }
  0xb4   :  { %v207_v13 = vpop.permute.xlu0 %206  }
  0xb5   :  { %v215_v14 = vpop.permute.xlu1 %214   ;;  %351 = vst.msk [vmem:[%s670_s1 + $0x4d] ss:$-48 sm:$0x3] %vm7_vm0, %v207_v13  }
  0xb6   :  { %352 = vst.msk [vmem:[%s670_s1 + $0x4e] ss:$-48 sm:$0x3] %vm7_vm0, %v215_v14  }
  0xb8   :  { %v223_v15 = vpop.permute.xlu0 %222  }
  0xb9   :  { %v229_v16 = vpop.permute.xlu1 %228   ;;  %353 = vst.msk [vmem:[%s670_s1 + $0x4f] ss:$-48 sm:$0x3] %vm7_vm0, %v223_v15  }
  0xba   :  { %354 = vst.msk [vmem:[%s670_s1 + $0x20] ss:$48 sm:$0x3] %vm7_vm0, %v229_v16  }
  0xbc   :  { %v235_v17 = vpop.permute.xlu0 %234  }
  0xbd   :  { %v241_v18 = vpop.permute.xlu1 %240   ;;  %355 = vst.msk [vmem:[%s670_s1 + $0x21] ss:$48 sm:$0x3] %vm7_vm0, %v235_v17  }
  0xbe   :  { %356 = vst.msk [vmem:[%s670_s1 + $0x22] ss:$48 sm:$0x3] %vm7_vm0, %v241_v18  }
  0xc0   :  { %v247_v19 = vpop.permute.xlu0 %246  }
  0xc1   :  { %v253_v20 = vpop.permute.xlu1 %252   ;;  %357 = vst.msk [vmem:[%s670_s1 + $0x23] ss:$48 sm:$0x3] %vm7_vm0, %v247_v19  }
  0xc2   :  { %358 = vst.msk [vmem:[%s670_s1 + $0x24] ss:$48 sm:$0x3] %vm7_vm0, %v253_v20  }
  0xc4   :  { %v259_v21 = vpop.permute.xlu0 %258  }
  0xc5   :  { %v265_v22 = vpop.permute.xlu1 %264   ;;  %359 = vst.msk [vmem:[%s670_s1 + $0x25] ss:$48 sm:$0x3] %vm7_vm0, %v259_v21  }
  0xc6   :  { %360 = vst.msk [vmem:[%s670_s1 + $0x26] ss:$48 sm:$0x3] %vm7_vm0, %v265_v22  }
  0xc8   :  { %v271_v23 = vpop.permute.xlu0 %270  }
  0xc9   :  { %v277_v24 = vpop.permute.xlu1 %276   ;;  %361 = vst.msk [vmem:[%s670_s1 + $0x27] ss:$48 sm:$0x3] %vm7_vm0, %v271_v23  }
  0xca   :  { %362 = vst.msk [vmem:[%s670_s1 + $0x28] ss:$48 sm:$0x3] %vm7_vm0, %v277_v24  }
  0xcc   :  { %v283_v25 = vpop.permute.xlu0 %282  }
  0xcd   :  { %v289_v26 = vpop.permute.xlu1 %288   ;;  %363 = vst.msk [vmem:[%s670_s1 + $0x29] ss:$48 sm:$0x3] %vm7_vm0, %v283_v25  }
  0xce   :  { %364 = vst.msk [vmem:[%s670_s1 + $0x2a] ss:$48 sm:$0x3] %vm7_vm0, %v289_v26  }
  0xd0   :  { %v295_v27 = vpop.permute.xlu0 %294  }
  0xd1   :  { %v301_v28 = vpop.permute.xlu1 %300   ;;  %365 = vst.msk [vmem:[%s670_s1 + $0x2b] ss:$48 sm:$0x3] %vm7_vm0, %v295_v27  }
  0xd2   :  { %366 = vst.msk [vmem:[%s670_s1 + $0x2c] ss:$48 sm:$0x3] %vm7_vm0, %v301_v28  }
  0xd4   :  { %v307_v29 = vpop.permute.xlu0 %306  }
  0xd5   :  { %v313_v30 = vpop.permute.xlu1 %312   ;;  %367 = vst.msk [vmem:[%s670_s1 + $0x2d] ss:$48 sm:$0x3] %vm7_vm0, %v307_v29  }
  0xd6   :  { %368 = vst.msk [vmem:[%s670_s1 + $0x2e] ss:$48 sm:$0x3] %vm7_vm0, %v313_v30  }
  0xd8   :  { %v319_v31 = vpop.permute.xlu0 %318  }
  0xd9   :  { %369 = vst.msk [vmem:[%s670_s1 + $0x2f] ss:$48 sm:$0x3] %vm7_vm0, %v319_v31  }

// kernel: encoder_forward.4
= control target key start
LH: loop header
LB: loop body
LE: loop exit
PB: predicated region body
PF: predicated region fallthrough
CT: control target
= control target key end

     0   :  { %s635_s15 = smov 0   ;;  %s717_s0 = inlined_call_operand.vmem [shape: bf16[96,128], index: 0, kind: input, shape index: {}]   ;;  %s718_s1 = inlined_call_operand.vmem [shape: bf16[128,128], index: 1, kind: input, shape index: {}]   ;;  %s719_s2 = inlined_call_operand.vmem [shape: f32[1,128], index: 2, kind: input, shape index: {}]   ;;  %s720_s3 = inlined_call_operand.vmem [shape: f32[96,1], index: 3, kind: input, shape index: {}]   ;;  %s721_s4 = inlined_call_operand.vmem [shape: f32[96,128], index: 4, kind: output, shape index: {}]  }
   0x1 LB: > { %s498_s16 = sadd.s32 4294967295, %s605_s15   ;;  %p502_p0 = scmp.ge.s32.totalorder %s605_s15, 1  ;;  %s605_s15 = sphi %s635_s15, %s14_s15  }
   0x2   : > { %p174_p1 = scmp.lt.s32.totalorder %s605_s15, 3 }
   0x4   : > { %p175_p2 = pnand %p502_p0, %p174_p1 }
   0x5   : > { %v588_v0 = vld [vmem:[%s718_s1] sm:$0xff] (!%p175_p2)   ;;  %v607_v1 = vmov (!%p175_p2), 0.0   ;;  %v589_v2 = vld [vmem:[%s718_s1 + $0x8] sm:$0xff] (!%p175_p2)   ;;  %s205_s21 = smul.u32 (!%p175_p2), 6, %s498_s16  ;;  %vm608_vm0 = vmmov (!%p175_p2), 0   ;;  %v609_v3 = vmov (!%p175_p2), 0  }
   0x6   : > { %178 = sbr.rel (%p175_p2) target bundleno = 267 (0x10b), region = 36  ;;  %531 = vmatprep.subr.bf16.mxu0 (!%p175_p2), %v607_v1  ;;  %559 = vmatprep.subr.bf16.mxu1 (!%p175_p2), %v607_v1  ;;  %v590_v4 = vld [vmem:[%s718_s1 + $0x10] sm:$0xff] (!%p175_p2)   ;;  %v591_v5 = vld [vmem:[%s718_s1 + $0x18] sm:$0xff] (!%p175_p2)   ;;  %v592_v8 = vld [vmem:[%s718_s1 + $0x20] sm:$0xff] (!%p175_p2)  }
   0x7   : > { %532 = vmatpush3.bf16.msra.mxu0 (!%p175_p2), %v588_v0  ;;  %567 = vmatpush3.bf16.msra.mxu1 (!%p175_p2), %v588_v0  ;;  %p206_p3 = scmp.lt.s32.totalorder (!%p175_p2), %s205_s21, 11  ;;  %v593_v11 = vld [vmem:[%s718_s1 + $0x28] sm:$0xff] (!%p175_p2)   ;;  %v594_v14 = vld [vmem:[%s718_s1 + $0x30] sm:$0xff] (!%p175_p2)   ;;  %v595_v15 = vld [vmem:[%s718_s1 + $0x38] sm:$0xff] (!%p175_p2)  }
   0x8   : > { %533 = vmatprep.subr.bf16.mxu0 (!%p175_p2), %v607_v1  ;;  %560 = vmatprep.subr.bf16.mxu1 (!%p175_p2), %v607_v1  ;;  %v506_v19 = vld [vmem:[%s719_s2] ss:$0 sm:$0xff] (!%p175_p2) }
   0x9   : > { %547 = vmatprep.mubr.msk.bf16.mxu0 (!%p175_p2), %vm608_vm0, %v607_v1  ;;  %551 = vmatprep.mubr.msk.bf16.mxu1 (!%p175_p2), %vm608_vm0, %v607_v1 }
   0xa   : > { %587 = vset.pattern.permute.xlu1 (!%p175_p2), %v609_v3  ;;  %586 = vset.pattern.permute.xlu0 (!%p175_p2), %v609_v3 }
   0xb   : > { %534 = vmatpush3.bf16.msra.mxu0 (!%p175_p2), %v589_v2  ;;  %568 = vmatpush3.bf16.msra.mxu1 (!%p175_p2), %v589_v2 }
   0xc   : > { %535 = vmatprep.subr.bf16.mxu0 (!%p175_p2), %v607_v1  ;;  %561 = vmatprep.subr.bf16.mxu1 (!%p175_p2), %v607_v1 }
   0xd   : > { %s723_s21 = smov (!%p206_p3, %s205_s21), 11 }
   0xe   : > { %s503_s24 = sshll.u32 %s723_s21, 2  ;;  %s504_s25 = sshll.u32 %s723_s21, 3 }
   0xf   : > { %s669_s28 = scalar_lea.vmem %s717_s0, %s503_s24  ;;  %536 = vmatpush3.bf16.msra.mxu0 %v590_v4  ;;  %569 = vmatpush3.bf16.msra.mxu1 %v590_v4  ;;  %s215_s7 = scalar_lea.vmem %s720_s3, %s504_s25 }
  0x10   : > { %537 = vmatprep.subr.bf16.mxu0 %v607_v1  ;;  %562 = vmatprep.subr.bf16.mxu1 %v607_v1  ;;  %v384_v6 = vld [vmem:[%s215_s7 + $0x10] sm:$0xff]  ;;  %v382_v7 = vld [vmem:[%s215_s7] sm:$0xff]  ;;  %v385_v9 = vld [vmem:[%s215_s7 + $0x18] sm:$0xff]  ;;  %s221_s22 = scalar_lea.vmem %s721_s4, %s504_s25 }
  0x11   : > { %400 = vperm.xlu1 %587, %v384_v6   ;;  %390 = vperm.xlu0 %586, %v382_v7   ;;  %v383_v10 = vld [vmem:[%s215_s7 + $0x8] sm:$0xff]  ;;  %v386_v13 = vld [vmem:[%s215_s7 + $0x20] sm:$0xff]  ;;  %v598_v18 = vld [vmem:[%s669_s28 + $0x10] sm:$0xff]  }
  0x12   : > { %v387_v12 = vld [vmem:[%s215_s7 + $0x28] sm:$0xff]  ;;  %v596_v16 = vld [vmem:[%s669_s28] sm:$0xff]  }
  0x13   : > { %538 = vmatpush3.bf16.msra.mxu0 %v591_v5  ;;  %570 = vmatpush3.bf16.msra.mxu1 %v591_v5  ;;  %v597_v17 = vld [vmem:[%s669_s28 + $0x8] sm:$0xff]  }
  0x14   : > { %539 = vmatprep.subr.bf16.mxu0 %v607_v1  ;;  %563 = vmatprep.subr.bf16.mxu1 %v607_v1 }
  0x15   : > { %405 = vperm.xlu1 %587, %v385_v9   ;;  %395 = vperm.xlu0 %586, %v383_v10  }
  0x17   : > { %540 = vmatpush3.bf16.msra.mxu0 %v592_v8  ;;  %571 = vmatpush3.bf16.msra.mxu1 %v592_v8 }
  0x18   : > { %541 = vmatprep.subr.bf16.mxu0 %v607_v1  ;;  %564 = vmatprep.subr.bf16.mxu1 %v607_v1 }
  0x19   : > { %415 = vperm.xlu1 %587, %v387_v12   ;;  %410 = vperm.xlu0 %586, %v386_v13  }
  0x1b   : > { %542 = vmatpush3.bf16.msra.mxu0 %v593_v11  ;;  %572 = vmatpush3.bf16.msra.mxu1 %v593_v11 }
  0x1c   : > { %543 = vmatprep.subr.bf16.mxu0 %v607_v1  ;;  %565 = vmatprep.subr.bf16.mxu1 %v607_v1 }
  0x1f   : > { %544 = vmatpush3.bf16.msra.mxu0 %v594_v14  ;;  %573 = vmatpush3.bf16.msra.mxu1 %v594_v14 }
  0x20   : > { %545 = vmatprep.subr.bf16.mxu0 %v607_v1  ;;  %566 = vmatprep.subr.bf16.mxu1 %v607_v1 }
  0x23   : > { %546 = vmatpush3.bf16.msra.mxu0 %v595_v15  ;;  %574 = vmatpush3.bf16.msra.mxu1 %v595_v15 }
  0x26   : > { %548 = vmatmul.mubr.bf16.vlgmr.msra.gmra.mrb[0].mxu0 %v596_v16  ;;  %552 = vmatmul.mubr.bf16.vlgmr.msra.gmra.mrb[0].mxu1 %v597_v17 }
  0x27   : > { %555 = vmatprep.mubr.msk.bf16.mxu1 %vm608_vm0, %v607_v1 }
  0x2e   : > { %556 = vmatmul.mubr.bf16.gmra.mrb[4].mxu1 %v598_v18 }
  0x90   : > { %v401_v20 = vpop.permute.xlu1 %400  ;;  %v391_v21 = vpop.permute.xlu0 %390 }
  0x94   : > { %v406_v40 = vpop.permute.xlu1 %405  ;;  %v396_v41 = vpop.permute.xlu0 %395 }
  0x98   : > { %v411_v51 = vpop.permute.xlu0 %410  ;;  %v416_v54 = vpop.permute.xlu1 %415 }
  0xf9   : > { %v353_v22 = vpop.f32.mrb[0].mxu0  ;;  %v361_v23 = vpop.f32.mrb[0].mxu1 }
  0xfa   : > { %v354_v24 = vadd.f32 %v506_v19, %v353_v22  ;;  %v362_v25 = vadd.f32 %v506_v19, %v361_v23  ;;  %v549_v26 = vpop.f32.mrb[1].mxu0  ;;  %v553_v27 = vpop.f32.mrb[1].mxu1 }
  0xfb   : > { %v356_v28 = vpop.f32.mrb[2].mxu0  ;;  %v364_v29 = vpop.f32.mrb[2].mxu1 }
  0xfc   : > { %v376_v30 = vmax.f32 %v354_v24, 0.0  ;;  %v378_v31 = vmax.f32 %v362_v25, 0.0  ;;  %v357_v32 = vadd.f32 %v506_v19, %v356_v28  ;;  %v365_v33 = vadd.f32 %v506_v19, %v364_v29  ;;  %v554_v34 = vpop.f32.mrb[3].mxu1  ;;  %v550_v35 = vpop.f32.mrb[3].mxu0 }
  0xfe   : > { %v418_v36 = vmul.f32 %v391_v21, %v376_v30  ;;  %v420_v37 = vmul.f32 %v401_v20, %v378_v31  ;;  %v377_v38 = vmax.f32 %v357_v32, 0.0  ;;  %v379_v39 = vmax.f32 %v365_v33, 0.0 }
 0x100   : > { %424 = vst [vmem:[%s221_s22] sm:$0xff] %v418_v36  ;;  %426 = vst [vmem:[%s221_s22 + $0x10] sm:$0xff] %v420_v37  ;;  %v419_v42 = vmul.f32 %v396_v41, %v377_v38  ;;  %v421_v43 = vmul.f32 %v406_v40, %v379_v39 }
 0x101   : > { %v369_v44 = vpop.f32.mrb[4].mxu1 }
 0x102   : > { %425 = vst [vmem:[%s221_s22 + $0x8] sm:$0xff] %v419_v42  ;;  %427 = vst [vmem:[%s221_s22 + $0x18] sm:$0xff] %v421_v43  ;;  %v370_v45 = vadd.f32 %v506_v19, %v369_v44  ;;  %v557_v46 = vpop.f32.mrb[5].mxu1 }
 0x103   : > { %v372_v47 = vpop.f32.mrb[6].mxu1 }
 0x104   : > { %v380_v48 = vmax.f32 %v370_v45, 0.0  ;;  %v373_v49 = vadd.f32 %v506_v19, %v372_v47  ;;  %v558_v50 = vpop.f32.mrb[7].mxu1 }
 0x106   : > { %v422_v52 = vmul.f32 %v411_v51, %v380_v48  ;;  %v381_v53 = vmax.f32 %v373_v49, 0.0 }
 0x108   : > { %428 = vst [vmem:[%s221_s22 + $0x20] sm:$0xff] %v422_v52  ;;  %v423_v55 = vmul.f32 %v416_v54, %v381_v53 }
 0x10a   : > { %429 = vst [vmem:[%s221_s22 + $0x28] sm:$0xff] %v423_v55 }
 0x10b PF: > { %s14_s15 = sadd.s32 1, %s605_s15  }
 0x10c   : > { %p11_p4 = scmp.ge.s32.totalorder %s14_s15, 4  }
 0x10e   :  { %13 = sbr.rel (!%p11_p4) target bundleno = 1 (0x1), region = 69 }

// kernel: encoder_forward.5
= control target key start
LH: loop header
LB: loop body
LE: loop exit
PB: predicated region body
PF: predicated region fallthrough
CT: control target
= control target key end

     0   :  { %s2600_s21 = smov 0   ;;  %s2602_s22 = smov 0   ;;  %s2942_s0 = inlined_call_operand.vmem [shape: f32[96,128], index: 0, kind: input, shape index: {}]   ;;  %s2943_s1 = inlined_call_operand.vmem [shape: f32[96,1], index: 1, kind: input, shape index: {}]   ;;  %s2944_s2 = inlined_call_operand.vmem [shape: bf16[3,9,128,128], index: 2, kind: input, shape index: {}]   ;;  %s2945_s3 = inlined_call_operand.vmem [shape: f32[3,1,128], index: 3, kind: input, shape index: {}]   ;;  %s2946_s4 = inlined_call_operand.vmem [shape: bf16[3,128,128], index: 4, kind: input, shape index: {}]   ;;  %s2947_s5 = inlined_call_operand.vmem [shape: f32[3,1,128], index: 5, kind: input, shape index: {}]   ;;  %s2948_s6 = inlined_call_operand.vmem [shape: f32[96,128], index: 6, kind: output, shape index: {}]  }
   0x1   :  { %s2604_s23 = smov 0   ;;  %s2606_s24 = smov 0  }
   0x2   :  { %s2608_s25 = smov 0  }
   0x3 LB: > { %s25_s26 = sadd.s32 1, %s2553_s23  ;;  %s28_s27 = sadd.s32 1, %s2557_s24  ;;  %s2561_s25 = sphi %s2608_s25, %s16_s25   ;;  %s2557_s24 = sphi %s2606_s24, %s2955_s24   ;;  %s2553_s23 = sphi %s2604_s23, %s2954_s23   ;;  %s2549_s22 = sphi %s2602_s22, %s2953_s22   ;;  %s2545_s21 = sphi %s2600_s21, %s2952_s21  }
   0x4   : > { %p26_p0 = scmp.ge.s32.totalorder %s25_s26, 3  ;;  %p1841_p1 = scmp.ge.s32.totalorder %s2561_s25, 1 }
   0x5   : > { %p272_p2 = scmp.lt.s32.totalorder %s2561_s25, 7 }
   0x6   : > { %s2957_s26 = smov (%p26_p0, %s25_s26), 0  ;;  %s2959_s27 = smov (!%p26_p0, %s28_s27), %s2557_s24 }
   0x7   : > { %p273_p3 = pnand %p1841_p1, %p272_p2  ;;  %p30_p4 = scmp.ge.s32.totalorder %s2959_s27, 2 }
   0x8   : > { %s323_s28 = smul.u32 (!%p273_p3), 6, %s2549_s22  ;;  %p335_p5 = scmp.lt.s32.totalorder (!%p273_p3), %s2545_s21, 2 }
   0x9   : > { %s2961_s27 = smov (%p30_p4, %s2959_s27), 0  ;;  %276 = sbr.rel (%p273_p3) target bundleno = 666 (0x29a), region = 44 }
   0xa   : > { %2949 = sst [smem:[#allocation2_spill]] %s2961_s27  ;;  %p324_p6 = scmp.lt.s32.totalorder (!%p273_p3), %s323_s28, 11 }
   0xb   : > { %p1848_p7 = scmp.ne.s32.totalorder (!%p273_p3), %s2545_s21, 0 }
  0x10   : > { %s2634_s29 = scalar_select %p335_p5, %s2545_s21, 2 }
  0x11   : > { %s2963_s28 = smov (!%p324_p6, %s323_s28), 11  ;;  %361 = sbr.rel (%p1848_p7) target bundleno = 26 (0x1a), region = 48 }
  0x12   : > { %s2396_s30 = smul.u32 576, %s2634_s29  ;;  %s1842_s10 = sshll.u32 %s2963_s28, 3 }
  0x13   : > { %s2063_s11 = sshll.u32 %s2634_s29, 6  ;;  %s327_s14 = scalar_lea.vmem %s2942_s0, %s1842_s10 }
  0x14   : > { %s2648_s17 = scalar_lea.vmem %s2943_s1, %s1842_s10  ;;  %s2653_s20 = scalar_lea.vmem %s2944_s2, %s2396_s30  ;;  %v362_v0 = vld [vmem:[%s327_s14] sm:$0xff] (!%p1848_p7)  ;;  %v363_v1 = vld [vmem:[%s327_s14 + $0x8] sm:$0xff] (!%p1848_p7)  ;;  %v364_v2 = vld [vmem:[%s327_s14 + $0x10] sm:$0xff] (!%p1848_p7) }
  0x15   : > { %s2658_s7 = scalar_lea.vmem %s2946_s4, %s2063_s11  ;;  %s350_s12 = scalar_lea.vmem %s2947_s5, %s2634_s29  ;;  %v365_v3 = vld [vmem:[%s327_s14 + $0x18] sm:$0xff] (!%p1848_p7)  ;;  %v366_v4 = vld [vmem:[%s327_s14 + $0x20] sm:$0xff] (!%p1848_p7)  ;;  %v367_v5 = vld [vmem:[%s327_s14 + $0x28] sm:$0xff] (!%p1848_p7) }
  0x16   : > { %s2667_s15 = scalar_lea.vmem %s2948_s6, %s1842_s10 }
  0x17   : > { %368 = vst [vmem:[%s2667_s15] sm:$0xff] (!%p1848_p7), %v362_v0  ;;  %369 = vst [vmem:[%s2667_s15 + $0x8] sm:$0xff] (!%p1848_p7), %v363_v1 }
  0x18   : > { %370 = vst [vmem:[%s2667_s15 + $0x10] sm:$0xff] %v364_v2  ;;  %371 = vst [vmem:[%s2667_s15 + $0x18] sm:$0xff] %v365_v3 }
  0x19   : > { %372 = vst [vmem:[%s2667_s15 + $0x20] sm:$0xff] %v366_v4  ;;  %373 = vst [vmem:[%s2667_s15 + $0x28] sm:$0xff] %v367_v5 }
  0x1a PF: > { %v2439_v6 = vld [vmem:[%s2653_s20 + $0x40] sm:$0xff]   ;;  %v2441_v8 = vld [vmem:[%s2653_s20 + $0x48] sm:$0xff]   ;;  %v2443_v10 = vld [vmem:[%s2653_s20 + $0x50] sm:$0xff]   ;;  %v395_v17 = vlaneseq  ;;  %vm788_vm0 = vcmask 1043456   ;;  %s2950_s9 = scalar_lea.vmem %s2945_s3, %s2634_s29 }
  0x1b   : > { %v2440_v7 = vld [vmem:[%s2653_s20 + $0x100] sm:$0xff]   ;;  %2164 = vmatprep.subr.bf16.mxu1 %v2439_v6  ;;  %v2442_v9 = vld [vmem:[%s2653_s20 + $0x108] sm:$0xff]   ;;  %v2444_v11 = vld [vmem:[%s2653_s20 + $0x110] sm:$0xff]  }
  0x1c   : > { %2244 = vmatprep.subr.bf16.mxu0 %v2440_v7  ;;  %2165 = vmatpush3.bf16.msra.mxu1 %v2439_v6  ;;  %v2445_v12 = vld [vmem:[%s2653_s20 + $0x58] sm:$0xff]   ;;  %v2447_v14 = vld [vmem:[%s2653_s20 + $0x60] sm:$0xff]   ;;  %v2449_v16 = vld [vmem:[%s2653_s20 + $0x68] sm:$0xff]   ;;  %v2718_v31 = vshrl.u32 %v395_v17, 7 }
  0x1d   : > { %2245 = vmatpush3.bf16.msra.mxu0 %v2440_v7  ;;  %2166 = vmatprep.subr.bf16.mxu1 %v2441_v8  ;;  %v2446_v13 = vld [vmem:[%s2653_s20 + $0x118] sm:$0xff]   ;;  %v2448_v15 = vld [vmem:[%s2653_s20 + $0x120] sm:$0xff]   ;;  %v2450_v20 = vld [vmem:[%s2653_s20 + $0x128] sm:$0xff]  }
  0x1e   : > { %2246 = vmatprep.subr.bf16.mxu0 %v2442_v9  ;;  %v2451_v26 = vld [vmem:[%s2653_s20 + $0x70] sm:$0xff]   ;;  %v2453_v37 = vld [vmem:[%s2653_s20 + $0x78] sm:$0xff]   ;;  %vm413_vm1 = vcmp.lt.s32.totalorder %v2718_v31, 7  ;;  %vm397_vm2 = vcmp.lt.s32.totalorder %v2718_v31, 1  ;;  %v2455_v47 = vld [vmem:[%s2653_s20] sm:$0xff]  }
  0x1f   : > { %v2452_v34 = vld [vmem:[%s2653_s20 + $0x130] sm:$0xff]   ;;  %v2454_v41 = vld [vmem:[%s2653_s20 + $0x138] sm:$0xff]   ;;  %v2456_v52 = vld [vmem:[%s2653_s20 + $0x140] sm:$0xff]  }
  0x20   : > { %2167 = vmatpush3.bf16.msra.mxu1 %v2441_v8  ;;  %v374_v18 = vld [vmem:[%s2667_s15] sm:$0xff]  ;;  %v2691_v19 = vld [vmem:[%s2667_s15 + $0x8] sm:$0xff]  ;;  %v2459_v7 = vld [vmem:[%s2653_s20 + $0x10] sm:$0xff]  }
  0x21   : > { %2247 = vmatpush3.bf16.msra.mxu0 %v2442_v9  ;;  %2168 = vmatprep.subr.bf16.mxu1 %v2443_v10  ;;  %v2694_v21 = vmax.f32 %v374_v18, 0.0  ;;  %v2697_v22 = vmax.f32 %v2691_v19, 0.0  ;;  %v2700_v23 = vld [vmem:[%s2667_s15 + $0x10] sm:$0xff]  ;;  %v2703_v24 = vld [vmem:[%s2667_s15 + $0x18] sm:$0xff]  ;;  %v2715_v29 = vld [vmem:[%s2667_s15 + $0x20] sm:$0xff] }
  0x22   : > { %2248 = vmatprep.subr.bf16.mxu0 %v2444_v11  ;;  %v2706_v25 = vmax.f32 %v2700_v23, 0.0  ;;  %v2712_v28 = vmax.f32 %v2703_v24, 0.0  ;;  %v379_v30 = vld [vmem:[%s2667_s15 + $0x28] sm:$0xff]  ;;  %v2721_v32 = vmax.f32 %v2715_v29, 0.0  ;;  %v2462_v17 = vld [vmem:[%s2653_s20 + $0x158] sm:$0xff]   ;;  %v2472_v31 = vld [vmem:[%s2653_s20 + $0x180] sm:$0xff]  }
  0x23   : > { %v386_v27 = vpack.c.bf16 %v2697_v22, %v2694_v21  ;;  %v2723_v33 = vmax.f32 %v379_v30, 0.0  ;;  %v407_v38 = vrot.slane %v2694_v21, 1  ;;  %v408_v39 = vrot.slane %v2697_v22, 1  ;;  %v2457_v62 = vld [vmem:[%s2653_s20 + $0x8] sm:$0xff]   ;;  %v2467_v30 = vld [vmem:[%s2653_s20 + $0x30] sm:$0xff]  }
  0x24   : > { %2169 = vmatpush3.bf16.msra.mxu1 %v2443_v10  ;;  %v2728_v36 = vpack.c.bf16 %v2712_v28, %v2706_v25  ;;  %v389_v44 = vrot.slane %v2694_v21, 7  ;;  %v390_v45 = vrot.slane %v2697_v22, 7  ;;  %v409_v48 = vrot.slane %v2706_v25, 1  ;;  %v2458_v1 = vld [vmem:[%s2653_s20 + $0x148] sm:$0xff]   ;;  %v2460_v10 = vld [vmem:[%s2653_s20 + $0x150] sm:$0xff]   ;;  %v2463_v22 = vld [vmem:[%s2653_s20 + $0x20] sm:$0xff]  }
  0x25   : > { %2249 = vmatpush3.bf16.msra.mxu0 %v2444_v11  ;;  %2170 = vmatprep.subr.bf16.mxu1 %v2445_v12  ;;  %v917_v35 = vrot.slane %v386_v27, 4  ;;  %v2737_v42 = vpack.c.bf16 %v2723_v33, %v2721_v32  ;;  %v394_v46 = vrot.slane %v2723_v33, 7  ;;  %v418_v49 = vsel %vm413_vm1, %v407_v38, %v408_v39 }
  0x26   : > { %2250 = vmatprep.subr.bf16.mxu0 %v2446_v13  ;;  %2180 = vmatprep.mubr.bf16.mxu1 %v386_v27  ;;  %v918_v40 = vrot.slane %v2728_v36, 4  ;;  %v410_v51 = vrot.slane %v2712_v28, 1  ;;  %v402_v53 = vsel %vm397_vm2, %v389_v44, %v390_v45  ;;  %v411_v54 = vrot.slane %v2721_v32, 1  ;;  %v2466_v27 = vld [vmem:[%s2653_s20 + $0x168] sm:$0xff]  }
  0x27   : > { %v920_v50 = vrot.slane %v2737_v42, 4  ;;  %v417_v55 = vsel %vm413_vm1, %v408_v39, %v409_v48  ;;  %v403_v56 = vsel %vm397_vm2, %v394_v46, %v389_v44  ;;  %v391_v59 = vrot.slane %v2706_v25, 7  ;;  %v2464_v25 = vld [vmem:[%s2653_s20 + $0x160] sm:$0xff]   ;;  %v2475_v44 = vld [vmem:[%s2653_s20 + $0x90] sm:$0xff]  }
  0x28   : > { %2171 = vmatpush3.bf16.msra.mxu1 %v2445_v12  ;;  %v919_v43 = vsel %vm788_vm0, %v917_v35, %v918_v40  ;;  %v416_v57 = vsel %vm413_vm1, %v409_v48, %v410_v51  ;;  %v2763_v58 = vpack.c.bf16 %v417_v55, %v418_v49  ;;  %v415_v60 = vsel %vm413_vm1, %v410_v51, %v411_v54  ;;  %v2479_v48 = vld [vmem:[%s2653_s20 + $0xa0] sm:$0xff]   ;;  %v2482_v51 = vld [vmem:[%s2653_s20 + $0x1a8] sm:$0xff]   ;;  %v2486_v55 = vld [vmem:[%s2653_s20 + $0x1b8] sm:$0xff]  }
  0x29   : > { %2251 = vmatpush3.bf16.msra.mxu0 %v2446_v13  ;;  %2172 = vmatprep.subr.bf16.mxu1 %v2447_v14  ;;  %v921_v61 = vsel %vm788_vm0, %v918_v40, %v920_v50  ;;  %v2772_v63 = vpack.c.bf16 %v415_v60, %v416_v57  ;;  %v2776_v2 = vpack.c.bf16 %v402_v53, %v403_v56  ;;  %v392_v3 = vrot.slane %v2712_v28, 7  ;;  %v2470_v40 = vld [vmem:[%s2653_s20 + $0x178] sm:$0xff]   ;;  %v2480_v49 = vld [vmem:[%s2653_s20 + $0x1a0] sm:$0xff]   ;;  %v2481_v50 = vld [vmem:[%s2653_s20 + $0xa8] sm:$0xff]  }
  0x2a   : > { %2252 = vmatprep.subr.bf16.mxu0 %v2448_v15  ;;  %2260 = vmatprep.mubr.bf16.mxu0 %v919_v43  ;;  %v1045_v0 = vrot.slane %v2763_v58, 4  ;;  %v401_v5 = vsel %vm397_vm2, %v390_v45, %v391_v59  ;;  %v393_v9 = vrot.slane %v2721_v32, 7  ;;  %v412_v28 = vrot.slane %v2723_v33, 1  ;;  %v2469_v33 = vld [vmem:[%s2653_s20 + $0x38] sm:$0xff]   ;;  %v2471_v32 = vld [vmem:[%s2653_s20 + $0x80] sm:$0xff]   ;;  %v2474_v43 = vld [vmem:[%s2653_s20 + $0x188] sm:$0xff]  }
  0x2b   : > { %v1046_v4 = vrot.slane %v2772_v63, 4  ;;  %v400_v6 = vsel %vm397_vm2, %v391_v59, %v392_v3  ;;  %v2476_v45 = vld [vmem:[%s2653_s20 + $0x190] sm:$0xff]   ;;  %v2487_v56 = vld [vmem:[%s2653_s20 + $0xc0] sm:$0xff]   ;;  %v2489_v59 = vld [vmem:[%s2653_s20 + $0xc8] sm:$0xff]  }
  0x2c   : > { %2173 = vmatpush3.bf16.msra.mxu1 %v2447_v14  ;;  %v2792_v11 = vpack.c.bf16 %v400_v6, %v401_v5  ;;  %v398_v12 = vsel %vm397_vm2, %v393_v9, %v394_v46  ;;  %v399_v13 = vsel %vm397_vm2, %v392_v3, %v393_v9  ;;  %v414_v35 = vsel %vm413_vm1, %v411_v54, %v412_v28  ;;  %v2477_v46 = vld [vmem:[%s2653_s20 + $0x98] sm:$0xff]   ;;  %v2484_v53 = vld [vmem:[%s2653_s20 + $0x1b0] sm:$0xff]   ;;  %v2488_v57 = vld [vmem:[%s2653_s20 + $0x1c0] sm:$0xff]  }
  0x2d   : > { %2253 = vmatpush3.bf16.msra.mxu0 %v2448_v15  ;;  %2174 = vmatprep.subr.bf16.mxu1 %v2449_v16  ;;  %v1047_v8 = vsel %vm788_vm0, %v1045_v0, %v1046_v4  ;;  %v2798_v14 = vpack.c.bf16 %v398_v12, %v399_v13  ;;  %v2485_v54 = vld [vmem:[%s2653_s20 + $0xb8] sm:$0xff]   ;;  %v2490_v60 = vld [vmem:[%s2653_s20 + $0x1c8] sm:$0xff]   ;;  %v2492_v0 = vld [vmem:[%s2653_s20 + $0x1d0] sm:$0xff]  }
  0x2e   : > { %2254 = vmatprep.subr.bf16.mxu0 %v2450_v20  ;;  %v790_v15 = vrot.slane %v2792_v11, 4  ;;  %v2495_v3 = vld [vmem:[%s2653_s20 + $0xe0] sm:$0xff]   ;;  %v2498_v5 = vld [vmem:[%s2653_s20 + $0x1e8] sm:$0xff]   ;;  %v2499_v6 = vld [vmem:[%s2653_s20 + $0xf0] sm:$0xff]  }
  0x2f   : > { %v792_v18 = vrot.slane %v2798_v14, 4  ;;  %v2502_v9 = vld [vmem:[%s2653_s20 + $0x1f8] sm:$0xff]   ;;  %v2505_v12 = vld [vmem:[%s2653_s20 + $0x210] sm:$0xff]  }
  0x30   : > { %2175 = vmatpush3.bf16.msra.mxu1 %v2449_v16  ;;  %v2461_v16 = vld [vmem:[%s2653_s20 + $0x18] sm:$0xff]  }
  0x31   : > { %2255 = vmatpush3.bf16.msra.mxu0 %v2450_v20  ;;  %2176 = vmatprep.subr.bf16.mxu1 %v2451_v26  ;;  %v2807_v20 = vsel %vm788_vm0, %v790_v15, %v792_v18  ;;  %v2506_v13 = vld [vmem:[%s2653_s20 + $0x218] sm:$0xff]  }
  0x32   : > { %2256 = vmatprep.subr.bf16.mxu0 %v2452_v34  ;;  %v1520_v18 = vld [vmem:[%s2648_s17 + $0x18] sm:$0xff] }
  0x34   : > { %2177 = vmatpush3.bf16.msra.mxu1 %v2451_v26  ;;  %v2465_v26 = vld [vmem:[%s2653_s20 + $0x28] sm:$0xff]  }
  0x35   : > { %2257 = vmatpush3.bf16.msra.mxu0 %v2452_v34  ;;  %2178 = vmatprep.subr.bf16.mxu1 %v2453_v37  ;;  %v2468_v34 = vld [vmem:[%s2653_s20 + $0x170] sm:$0xff]  }
  0x36   : > { %2258 = vmatprep.subr.bf16.mxu0 %v2454_v41 }
  0x38   : > { %2179 = vmatpush3.bf16.msra.mxu1 %v2453_v37  ;;  %v419_v37 = vsel %vm413_vm1, %v412_v28, %v407_v38 }
  0x39   : > { %2259 = vmatpush3.bf16.msra.mxu0 %v2454_v41  ;;  %2184 = vmatprep.subr.bf16.mxu1 %v2455_v47  ;;  %v2825_v39 = vpack.c.bf16 %v419_v37, %v414_v35  ;;  %v2473_v41 = vld [vmem:[%s2653_s20 + $0x88] sm:$0xff]  }
  0x3a   : > { %2264 = vmatprep.subr.bf16.mxu0 %v2456_v52 }
  0x3b   : > { %2181 = vmatmul.mubr.bf16.vlgmr.msra.gmra.mrb[0].mxu1 %v2728_v36  ;;  %v1048_v21 = vrot.slane %v2825_v39, 4 }
  0x3c   : > { %2185 = vmatpush3.bf16.msra.mxu1 %v2455_v47  ;;  %2261 = vmatmul.mubr.bf16.vlgmr.msra.gmra.mrb[0].mxu0 %v921_v61  ;;  %v2478_v47 = vld [vmem:[%s2653_s20 + $0x198] sm:$0xff]  }
  0x3d   : > { %2265 = vmatpush3.bf16.msra.mxu0 %v2456_v52  ;;  %2186 = vmatprep.subr.bf16.mxu1 %v2457_v62  ;;  %v1049_v38 = vsel %vm788_vm0, %v1046_v4, %v1048_v21  ;;  %v2483_v52 = vld [vmem:[%s2653_s20 + $0xb0] sm:$0xff]   ;;  %v2496_v4 = vld [vmem:[%s2653_s20 + $0x1e0] sm:$0xff]  }
  0x3e   : > { %2266 = vmatprep.subr.bf16.mxu0 %v2458_v1  ;;  %2200 = vmatprep.mubr.bf16.mxu1 %v2776_v2 }
  0x3f   : > { %2280 = vmatprep.mubr.bf16.mxu0 %v1047_v8  ;;  %v2501_v8 = vld [vmem:[%s2653_s20 + $0xf8] sm:$0xff]  }
  0x40   : > { %2187 = vmatpush3.bf16.msra.mxu1 %v2457_v62  ;;  %v2491_v62 = vld [vmem:[%s2653_s20 + $0xd0] sm:$0xff]  }
  0x41   : > { %2267 = vmatpush3.bf16.msra.mxu0 %v2458_v1  ;;  %2188 = vmatprep.subr.bf16.mxu1 %v2459_v7  ;;  %v2493_v1 = vld [vmem:[%s2653_s20 + $0xd8] sm:$0xff]  }
  0x42   : > { %2268 = vmatprep.subr.bf16.mxu0 %v2460_v10 }
  0x44   : > { %2189 = vmatpush3.bf16.msra.mxu1 %v2459_v7  ;;  %v2500_v7 = vld [vmem:[%s2653_s20 + $0x1f0] sm:$0xff]  }
  0x45   : > { %2269 = vmatpush3.bf16.msra.mxu0 %v2460_v10  ;;  %2190 = vmatprep.subr.bf16.mxu1 %v2461_v16  ;;  %v2503_v10 = vld [vmem:[%s2653_s20 + $0x200] sm:$0xff]  }
  0x46   : > { %2270 = vmatprep.subr.bf16.mxu0 %v2462_v17 }
  0x48   : > { %2191 = vmatpush3.bf16.msra.mxu1 %v2461_v16  ;;  %v1518_v16 = vld [vmem:[%s2648_s17 + $0x8] sm:$0xff] }
  0x49   : > { %2271 = vmatpush3.bf16.msra.mxu0 %v2462_v17  ;;  %2192 = vmatprep.subr.bf16.mxu1 %v2463_v22  ;;  %v1519_v17 = vld [vmem:[%s2648_s17 + $0x10] sm:$0xff] }
  0x4a   : > { %2272 = vmatprep.subr.bf16.mxu0 %v2464_v25 }
  0x4c   : > { %2193 = vmatpush3.bf16.msra.mxu1 %v2463_v22 }
  0x4d   : > { %2273 = vmatpush3.bf16.msra.mxu0 %v2464_v25  ;;  %2194 = vmatprep.subr.bf16.mxu1 %v2465_v26 }
  0x4e   : > { %2274 = vmatprep.subr.bf16.mxu0 %v2466_v27 }
  0x50   : > { %2195 = vmatpush3.bf16.msra.mxu1 %v2465_v26 }
  0x51   : > { %2275 = vmatpush3.bf16.msra.mxu0 %v2466_v27  ;;  %2196 = vmatprep.subr.bf16.mxu1 %v2467_v30 }
  0x52   : > { %2276 = vmatprep.subr.bf16.mxu0 %v2468_v34 }
  0x54   : > { %2197 = vmatpush3.bf16.msra.mxu1 %v2467_v30  ;;  %v2049_v30 = vld [vmem:[%s2950_s9] ss:$0 sm:$0xff] }
  0x55   : > { %2277 = vmatpush3.bf16.msra.mxu0 %v2468_v34  ;;  %2198 = vmatprep.subr.bf16.mxu1 %v2469_v33 }
  0x56   : > { %2278 = vmatprep.subr.bf16.mxu0 %v2470_v40 }
  0x58   : > { %2199 = vmatpush3.bf16.msra.mxu1 %v2469_v33 }
  0x59   : > { %2279 = vmatpush3.bf16.msra.mxu0 %v2470_v40  ;;  %2204 = vmatprep.subr.bf16.mxu1 %v2471_v32 }
  0x5a   : > { %2284 = vmatprep.subr.bf16.mxu0 %v2472_v31 }
  0x5b   : > { %2201 = vmatmul.mubr.bf16.vlgmr.msra.gmra.mrb[0].mxu1 %v2792_v11 }
  0x5c   : > { %2205 = vmatpush3.bf16.msra.mxu1 %v2471_v32  ;;  %2281 = vmatmul.mubr.bf16.vlgmr.msra.gmra.mrb[0].mxu0 %v1049_v38 }
  0x5d   : > { %2285 = vmatpush3.bf16.msra.mxu0 %v2472_v31  ;;  %2206 = vmatprep.subr.bf16.mxu1 %v2473_v41 }
  0x5e   : > { %2286 = vmatprep.subr.bf16.mxu0 %v2474_v43  ;;  %2220 = vmatprep.mubr.bf16.mxu1 %v2763_v58  ;;  %v789_v58 = vrot.slane %v2776_v2, 4  ;;  %v2494_v2 = vld [vmem:[%s2653_s20 + $0x1d8] sm:$0xff]  }
  0x5f   : > { %2300 = vmatprep.mubr.bf16.mxu0 %v2792_v11  ;;  %v2504_v11 = vld [vmem:[%s2653_s20 + $0x208] sm:$0xff]  }
  0x60   : > { %2207 = vmatpush3.bf16.msra.mxu1 %v2473_v41  ;;  %v791_v61 = vsel %vm788_vm0, %v789_v58, %v790_v15  ;;  %v2509_v15 = vld [vmem:[%s2653_s20 + $0x230] sm:$0xff]  }
  0x61   : > { %2287 = vmatpush3.bf16.msra.mxu0 %v2474_v43  ;;  %2208 = vmatprep.subr.bf16.mxu1 %v2475_v44  ;;  %v2563_v43 = vmov (!%p1848_p7), 0  }
  0x62   : > { %2288 = vmatprep.subr.bf16.mxu0 %v2476_v45  ;;  %2512 = vset.pattern.permute.xlu1 (!%p1848_p7), %v2563_v43 }
  0x63   : > { %2511 = vset.pattern.permute.xlu0 (!%p1848_p7), %v2563_v43  ;;  %1537 = vperm.xlu1 (!%p1848_p7), %2512, %v1520_v18  }
  0x64   : > { %2209 = vmatpush3.bf16.msra.mxu1 %v2475_v44  ;;  %1527 = vperm.xlu0 (!%p1848_p7), %2511, %v1518_v16  }
  0x65   : > { %2289 = vmatpush3.bf16.msra.mxu0 %v2476_v45  ;;  %2210 = vmatprep.subr.bf16.mxu1 %v2477_v46 }
  0x66   : > { %2290 = vmatprep.subr.bf16.mxu0 %v2478_v47 }
  0x68   : > { %2211 = vmatpush3.bf16.msra.mxu1 %v2477_v46  ;;  %1532 = vperm.xlu0 (!%p1848_p7), %2511, %v1519_v17  }
  0x69   : > { %2291 = vmatpush3.bf16.msra.mxu0 %v2478_v47  ;;  %2212 = vmatprep.subr.bf16.mxu1 %v2479_v48 }
  0x6a   : > { %2292 = vmatprep.subr.bf16.mxu0 %v2480_v49 }
  0x6c   : > { %2213 = vmatpush3.bf16.msra.mxu1 %v2479_v48 }
  0x6d   : > { %2293 = vmatpush3.bf16.msra.mxu0 %v2480_v49  ;;  %2214 = vmatprep.subr.bf16.mxu1 %v2481_v50 }
  0x6e   : > { %2294 = vmatprep.subr.bf16.mxu0 %v2482_v51 }
  0x70   : > { %2215 = vmatpush3.bf16.msra.mxu1 %v2481_v50 }
  0x71   : > { %2295 = vmatpush3.bf16.msra.mxu0 %v2482_v51  ;;  %2216 = vmatprep.subr.bf16.mxu1 %v2483_v52 }
  0x72   : > { %2296 = vmatprep.subr.bf16.mxu0 %v2484_v53 }
  0x74   : > { %2217 = vmatpush3.bf16.msra.mxu1 %v2483_v52 }
  0x75   : > { %2297 = vmatpush3.bf16.msra.mxu0 %v2484_v53  ;;  %2218 = vmatprep.subr.bf16.mxu1 %v2485_v54 }
  0x76   : > { %2298 = vmatprep.subr.bf16.mxu0 %v2486_v55 }
  0x78   : > { %2219 = vmatpush3.bf16.msra.mxu1 %v2485_v54 }
  0x79   : > { %2299 = vmatpush3.bf16.msra.mxu0 %v2486_v55  ;;  %2224 = vmatprep.subr.bf16.mxu1 %v2487_v56 }
  0x7a   : > { %2304 = vmatprep.subr.bf16.mxu0 %v2488_v57 }
  0x7b   : > { %2221 = vmatmul.mubr.bf16.vlgmr.msra.gmra.mrb[0].mxu1 %v2772_v63 }
  0x7c   : > { %2225 = vmatpush3.bf16.msra.mxu1 %v2487_v56  ;;  %2301 = vmatmul.mubr.bf16.vlgmr.msra.gmra.mrb[0].mxu0 %v2798_v14  ;;  %v2507_v14 = vld [vmem:[%s2653_s20 + $0x220] sm:$0xff]  }
  0x7d   : > { %2305 = vmatpush3.bf16.msra.mxu0 %v2488_v57  ;;  %2226 = vmatprep.subr.bf16.mxu1 %v2489_v59 }
  0x7e   : > { %2306 = vmatprep.subr.bf16.mxu0 %v2490_v60  ;;  %2240 = vmatprep.mubr.bf16.mxu1 %v791_v61 }
  0x7f   : > { %2320 = vmatprep.mubr.bf16.mxu0 %v2728_v36  ;;  %v2497_v36 = vld [vmem:[%s2653_s20 + $0xe8] sm:$0xff]  }
  0x80   : > { %2227 = vmatpush3.bf16.msra.mxu1 %v2489_v59 }
  0x81   : > { %2307 = vmatpush3.bf16.msra.mxu0 %v2490_v60  ;;  %2228 = vmatprep.subr.bf16.mxu1 %v2491_v62 }
  0x82   : > { %2308 = vmatprep.subr.bf16.mxu0 %v2492_v0 }
  0x84   : > { %2229 = vmatpush3.bf16.msra.mxu1 %v2491_v62 }
  0x85   : > { %2309 = vmatpush3.bf16.msra.mxu0 %v2492_v0  ;;  %2230 = vmatprep.subr.bf16.mxu1 %v2493_v1 }
  0x86   : > { %2310 = vmatprep.subr.bf16.mxu0 %v2494_v2 }
  0x88   : > { %2231 = vmatpush3.bf16.msra.mxu1 %v2493_v1 }
  0x89   : > { %2311 = vmatpush3.bf16.msra.mxu0 %v2494_v2  ;;  %2232 = vmatprep.subr.bf16.mxu1 %v2495_v3 }
  0x8a   : > { %2312 = vmatprep.subr.bf16.mxu0 %v2496_v4 }
  0x8c   : > { %2233 = vmatpush3.bf16.msra.mxu1 %v2495_v3 }
  0x8d   : > { %2313 = vmatpush3.bf16.msra.mxu0 %v2496_v4  ;;  %2234 = vmatprep.subr.bf16.mxu1 %v2497_v36 }
  0x8e   : > { %2314 = vmatprep.subr.bf16.mxu0 %v2498_v5 }
  0x90   : > { %2235 = vmatpush3.bf16.msra.mxu1 %v2497_v36 }
  0x91   : > { %2315 = vmatpush3.bf16.msra.mxu0 %v2498_v5  ;;  %2236 = vmatprep.subr.bf16.mxu1 %v2499_v6 }
  0x92   : > { %2316 = vmatprep.subr.bf16.mxu0 %v2500_v7 }
  0x94   : > { %2237 = vmatpush3.bf16.msra.mxu1 %v2499_v6 }
  0x95   : > { %2317 = vmatpush3.bf16.msra.mxu0 %v2500_v7  ;;  %2238 = vmatprep.subr.bf16.mxu1 %v2501_v8 }
  0x96   : > { %2318 = vmatprep.subr.bf16.mxu0 %v2502_v9 }
  0x98   : > { %2239 = vmatpush3.bf16.msra.mxu1 %v2501_v8 }
  0x99   : > { %2319 = vmatpush3.bf16.msra.mxu0 %v2502_v9 }
  0x9a   : > { %2324 = vmatprep.subr.bf16.mxu0 %v2503_v10 }
  0x9b   : > { %2241 = vmatmul.mubr.bf16.vlgmr.msra.gmra.mrb[0].mxu1 %v2807_v20  ;;  %v1521_v20 = vld [vmem:[%s2648_s17 + $0x20] sm:$0xff] }
  0x9c   : > { %2321 = vmatmul.mubr.bf16.vlgmr.msra.gmra.mrb[0].mxu0 %v2737_v42  ;;  %v2508_v42 = vld [vmem:[%s2653_s20 + $0x228] sm:$0xff]   ;;  %1542 = vperm.xlu1 (!%p1848_p7), %2512, %v1521_v20  }
  0x9d   : > { %2325 = vmatpush3.bf16.msra.mxu0 %v2503_v10  ;;  %2340 = vmatprep.mubr.bf16.mxu0 %v2772_v63  ;;  %v2510_v63 = vld [vmem:[%s2653_s20 + $0x238] sm:$0xff]  }
  0x9e   : > { %2326 = vmatprep.subr.bf16.mxu0 %v2504_v11 }
  0xa1   : > { %2327 = vmatpush3.bf16.msra.mxu0 %v2504_v11 }
  0xa2   : > { %2328 = vmatprep.subr.bf16.mxu0 %v2505_v12 }
  0xa5   : > { %2329 = vmatpush3.bf16.msra.mxu0 %v2505_v12 }
  0xa6   : > { %2330 = vmatprep.subr.bf16.mxu0 %v2506_v13 }
  0xa9   : > { %2331 = vmatpush3.bf16.msra.mxu0 %v2506_v13 }
  0xaa   : > { %2332 = vmatprep.subr.bf16.mxu0 %v2507_v14 }
  0xad   : > { %2333 = vmatpush3.bf16.msra.mxu0 %v2507_v14 }
  0xae   : > { %2334 = vmatprep.subr.bf16.mxu0 %v2508_v42 }
  0xb1   : > { %2335 = vmatpush3.bf16.msra.mxu0 %v2508_v42 }
  0xb2   : > { %2336 = vmatprep.subr.bf16.mxu0 %v2509_v15 }
  0xb5   : > { %2337 = vmatpush3.bf16.msra.mxu0 %v2509_v15 }
  0xb6   : > { %2338 = vmatprep.subr.bf16.mxu0 %v2510_v63 }
  0xb9   : > { %2339 = vmatpush3.bf16.msra.mxu0 %v2510_v63 }
  0xbc   : > { %2341 = vmatmul.mubr.bf16.vlgmr.msra.gmra.mrb[0].mxu0 %v2825_v39 }
  0xe2   : > { %v1538_v44 = vpop.permute.xlu1 (!%p1848_p7), %1537 }
  0xe3   : > { %v1528_v45 = vpop.permute.xlu0 (!%p1848_p7), %1527 }
  0xe7   : > { %v1533_v49 = vpop.permute.xlu0 (!%p1848_p7), %1532 }
 0x11b   : > { %v1543_v48 = vpop.permute.xlu1 (!%p1848_p7), %1542 }
 0x16e   : > { %v2242_v22 = vpop.f32.mrb[0].mxu1 }
 0x16f   : > { %v878_v25 = vpop.f32.mrb[1].mxu1 }
 0x170   : > { %v2243_v26 = vpop.f32.mrb[2].mxu1 }
 0x171   : > { %v881_v27 = vpop.f32.mrb[3].mxu1 }
 0x18f   : > { %v2342_v28 = vpop.f32.mrb[0].mxu0  ;;  %1524 = sbr.rel (%p1848_p7) target bundleno = 410 (0x19a), region = 52 }
 0x190   : > { %v2364_v34 = vadd.f32 %v2342_v28, %v2242_v22  ;;  %v1488_v35 = vpop.f32.mrb[1].mxu0 }
 0x191   : > { %v2365_v37 = vadd.f32 %v1488_v35, %v878_v25  ;;  %v2343_v33 = vpop.f32.mrb[2].mxu0 }
 0x192   : > { %v2895_v40 = vadd.f32 %v2364_v34, %v2049_v30  ;;  %v2366_v39 = vadd.f32 %v2343_v33, %v2243_v26  ;;  %v1491_v32 = vpop.f32.mrb[3].mxu0 }
 0x193   : > { %v1514_v21 = vadd.f32 %v2365_v37, %v2049_v30  ;;  %v2367_v31 = vadd.f32 %v1491_v32, %v881_v27 }
 0x194   : > { %v1517_v38 = vadd.f32 %v2366_v39, %v2049_v30  ;;  %v1547_v46 = vmul.f32 (!%p1848_p7), %v1538_v44, %v2895_v40 }
 0x195   : > { %v1515_v41 = vadd.f32 %v2367_v31, %v2049_v30  ;;  %v1545_v47 = vmul.f32 (!%p1848_p7), %v1528_v45, %v1514_v21 }
 0x196   : > { %1551 = vst [vmem:[%s2667_s15 + $0x18] sm:$0xff] %v1547_v46  ;;  %v1548_v50 = vmul.f32 %v1543_v48, %v1517_v38 }
 0x197   : > { %1549 = vst [vmem:[%s2667_s15 + $0x8] sm:$0xff] %v1545_v47  ;;  %v1546_v51 = vmul.f32 %v1533_v49, %v1515_v41 }
 0x198   : > { %1552 = vst [vmem:[%s2667_s15 + $0x20] sm:$0xff] %v1548_v50 }
 0x199   : > { %1550 = vst [vmem:[%s2667_s15 + $0x10] sm:$0xff] %v1546_v51 }
 0x19a PF: > { %p2051_p8 = scmp.le.s32.totalorder %s2545_s21, 0 }
 0x19b   : > { %v2515_v52 = vld [vmem:[%s2658_s7] sm:$0xff] (!%p2051_p8)   ;;  %v1557_v53 = vmax.f32 (!%p2051_p8), %v1514_v21, 0.0  ;;  %v2516_v54 = vld [vmem:[%s2658_s7 + $0x8] sm:$0xff] (!%p2051_p8)   ;;  %v1558_v55 = vmax.f32 (!%p2051_p8), %v1515_v41, 0.0  ;;  %v2517_v57 = vld [vmem:[%s2658_s7 + $0x10] sm:$0xff] (!%p2051_p8)   ;;  %v2564_v58 = vmov (!%p2051_p8), 0  }
 0x19c   : > { %1556 = sbr.rel (%p2051_p8) target bundleno = 666 (0x29a), region = 56  ;;  %2344 = vmatprep.subr.bf16.mxu0 (!%p2051_p8), %v2515_v52  ;;  %2514 = vset.pattern.permute.xlu1 (!%p2051_p8), %v2564_v58  ;;  %v2518_v59 = vld [vmem:[%s2658_s7 + $0x18] sm:$0xff] (!%p2051_p8)   ;;  %v2519_v60 = vld [vmem:[%s2658_s7 + $0x20] sm:$0xff] (!%p2051_p8)   ;;  %v2520_v61 = vld [vmem:[%s2658_s7 + $0x28] sm:$0xff] (!%p2051_p8)   ;;  %v1559_v1 = vmax.f32 (!%p2051_p8), %v2895_v40, 0.0  ;;  %v1560_v2 = vmax.f32 (!%p2051_p8), %v1517_v38, 0.0 }
 0x19d   : > { %2345 = vmatpush3.bf16.msra.mxu0 (!%p2051_p8), %v2515_v52  ;;  %v1561_v56 = vpack.c.bf16 (!%p2051_p8), %v1558_v55, %v1557_v53  ;;  %2513 = vset.pattern.permute.xlu0 (!%p2051_p8), %v2564_v58  ;;  %v2521_v62 = vld [vmem:[%s2658_s7 + $0x30] sm:$0xff] (!%p2051_p8)   ;;  %v2522_v0 = vld [vmem:[%s2658_s7 + $0x38] sm:$0xff] (!%p2051_p8)   ;;  %v2052_v4 = vld [vmem:[%s350_s12] ss:$0 sm:$0xff] (!%p2051_p8) }
 0x19e   : > { %2346 = vmatprep.subr.bf16.mxu0 (!%p2051_p8), %v2516_v54  ;;  %1699 = vperm.xlu1 (!%p2051_p8), %2514, %v1520_v18   ;;  %v1562_v3 = vpack.c.bf16 (!%p2051_p8), %v1560_v2, %v1559_v1 }
 0x19f   : > { %2360 = vmatprep.mubr.bf16.mxu0 (!%p2051_p8), %v1561_v56  ;;  %1689 = vperm.xlu0 (!%p2051_p8), %2513, %v1518_v16  }
 0x1a1   : > { %2347 = vmatpush3.bf16.msra.mxu0 (!%p2051_p8), %v2516_v54 }
 0x1a2   : > { %2348 = vmatprep.subr.bf16.mxu0 (!%p2051_p8), %v2517_v57  ;;  %1704 = vperm.xlu1 (!%p2051_p8), %2514, %v1521_v20  }
 0x1a3   : > { %1694 = vperm.xlu0 %2513, %v1519_v17  }
 0x1a5   : > { %2349 = vmatpush3.bf16.msra.mxu0 %v2517_v57 }
 0x1a6   : > { %2350 = vmatprep.subr.bf16.mxu0 %v2518_v59 }
 0x1a9   : > { %2351 = vmatpush3.bf16.msra.mxu0 %v2518_v59 }
 0x1aa   : > { %2352 = vmatprep.subr.bf16.mxu0 %v2519_v60 }
 0x1ad   : > { %2353 = vmatpush3.bf16.msra.mxu0 %v2519_v60 }
 0x1ae   : > { %2354 = vmatprep.subr.bf16.mxu0 %v2520_v61 }
 0x1b1   : > { %2355 = vmatpush3.bf16.msra.mxu0 %v2520_v61 }
 0x1b2   : > { %2356 = vmatprep.subr.bf16.mxu0 %v2521_v62 }
 0x1b5   : > { %2357 = vmatpush3.bf16.msra.mxu0 %v2521_v62 }
 0x1b6   : > { %2358 = vmatprep.subr.bf16.mxu0 %v2522_v0 }
 0x1b9   : > { %2359 = vmatpush3.bf16.msra.mxu0 %v2522_v0 }
 0x1bc   : > { %2361 = vmatmul.mubr.bf16.vlgmr.msra.gmra.mrb[0].mxu0 %v1562_v3 }
 0x21d   : > { %v1700_v36 = vpop.permute.xlu1 %1699 }
 0x21e   : > { %v1690_v6 = vpop.permute.xlu0 %1689 }
 0x221   : > { %v1705_v17 = vpop.permute.xlu1 %1704 }
 0x222   : > { %v1695_v22 = vpop.permute.xlu0 %1694 }
 0x28f   : > { %v2362_v5 = vpop.f32.mrb[0].mxu0 }
 0x290   : > { %v1677_v7 = vadd.f32 %v2362_v5, %v2052_v4  ;;  %v1668_v8 = vpop.f32.mrb[1].mxu0 }
 0x291   : > { %v1669_v9 = vadd.f32 %v2052_v4, %v1668_v8  ;;  %v2363_v10 = vpop.f32.mrb[2].mxu0 }
 0x292   : > { %v1685_v11 = vadd.f32 %v1677_v7, %v2703_v24  ;;  %v1680_v12 = vadd.f32 %v2363_v10, %v2052_v4  ;;  %v1671_v13 = vpop.f32.mrb[3].mxu0 }
 0x293   : > { %v1683_v14 = vadd.f32 %v1669_v9, %v2691_v19  ;;  %v1672_v42 = vadd.f32 %v2052_v4, %v1671_v13 }
 0x294   : > { %v1709_v15 = vmul.f32 %v1700_v36, %v1685_v11  ;;  %v1686_v63 = vadd.f32 %v1680_v12, %v2715_v29 }
 0x295   : > { %v1707_v16 = vmul.f32 %v1690_v6, %v1683_v14  ;;  %v1684_v18 = vadd.f32 %v1672_v42, %v2700_v23 }
 0x296   : > { %1713 = vst [vmem:[%s2667_s15 + $0x18] sm:$0xff] %v1709_v15  ;;  %v1710_v20 = vmul.f32 %v1705_v17, %v1686_v63 }
 0x297   : > { %1711 = vst [vmem:[%s2667_s15 + $0x8] sm:$0xff] %v1707_v16  ;;  %v1708_v25 = vmul.f32 %v1695_v22, %v1684_v18 }
 0x298   : > { %1714 = vst [vmem:[%s2667_s15 + $0x20] sm:$0xff] %v1710_v20 }
 0x299   : > { %1712 = vst [vmem:[%s2667_s15 + $0x10] sm:$0xff] %v1708_v25 }
 0x29a PF: > { %s16_s25 = sadd.s32 1, %s2561_s25   ;;  %s2951_s29 = sld [smem:[#allocation2_spill]] }
 0x29b   : > { %p13_p9 = scmp.ge.s32.totalorder %s16_s25, 8   ;;  %s2952_s21 = smov %s2553_s23 }
 0x29c   : > { %s2953_s22 = smov %s2557_s24  ;;  %s2954_s23 = smov %s2957_s26 }
 0x29d   :  { %15 = sbr.rel (!%p13_p9) target bundleno = 3 (0x3), region = 109 }
 0x2a0   : > { %s2955_s24 = smov %s2951_s29 }

</bundles_post_ra>
